<compile_context>
chip_gen: v7x
topology: tpu7x:2x2x1
jax: 0.10.0
libtpu: 0.0.40
codegen_flags: <defaults>
</compile_context>

<pallas_src>
import functools

import jax
import jax.numpy as jnp
from jax.experimental import pallas as pl
from jax.experimental.pallas import tpu as pltpu


LATENT_DIM = 8
OUTPUT_DIM = 128
FEATS = [32, 64, 128, 256, 512]
BATCH = 16
LANE = 128

_INV_SQRT2 = 0.7071067811865476
_SQRT_2_OVER_PI = 0.7978845608028654


def _round_up(n, m):
    return ((n + m - 1) // m) * m


# ----------------------------------------------------------------------------
# Kernel
# ----------------------------------------------------------------------------
def _gelu(v, approximate):
    if approximate:
        # tanh-approx GELU: the transcendental runs on the EUP (its own VLIW
        # slot) instead of a long erf polynomial on the 4 VALU slots.  Slight
        # deviation from PyTorch's default exact-erf GELU -- opt-in only.
        return 0.5 * v * (1.0 + jnp.tanh(
            _SQRT_2_OVER_PI * (v + 0.044715 * v * v * v)))
    # PyTorch nn.GELU() default = exact erf GELU, computed in f32.
    return 0.5 * v * (1.0 + jax.lax.erf(v * _INV_SQRT2))


def _decoder_kernel(x_ref,
                    w0_ref, b0_ref, w1_ref, b1_ref, w2_ref, b2_ref,
                    w3_ref, b3_ref, w4_ref, b4_ref, w5_ref, b5_ref,
                    o_ref, *, gelu_approximate):
    h = x_ref[...].astype(jnp.float32)

    def linear(h, w_ref, b_ref):
        # Matmul operands in the weights' dtype (bf16 fast path / f32 exact),
        # f32 MXU accumulation; bias add + GELU stay in f32.
        lhs = h.astype(w_ref.dtype)
        return (jnp.dot(lhs, w_ref[...], preferred_element_type=jnp.float32)
                + b_ref[...])

    h = _gelu(linear(h, w0_ref, b0_ref), gelu_approximate)
    h = _gelu(linear(h, w1_ref, b1_ref), gelu_approximate)
    h = _gelu(linear(h, w2_ref, b2_ref), gelu_approximate)
    h = _gelu(linear(h, w3_ref, b3_ref), gelu_approximate)
    h = _gelu(linear(h, w4_ref, b4_ref), gelu_approximate)
    o_ref[...] = linear(h, w5_ref, b5_ref).astype(o_ref.dtype)


# ----------------------------------------------------------------------------
# One-time parameter preparation (hoisted out of the per-call forward)
# ----------------------------------------------------------------------------
def prepare_decoder_params(params, compute_dtype=jnp.bfloat16):
    """Pad + cast the decoder weights once, outside the jitted forward.

    * Zero-pads the latent input dim and every hidden feature dim up to a lane
      multiple (128) so all matmul operands / activations are lane-dense.
      Exact: padded bias lanes are 0, GELU(0) == 0, and the matching weight
      rows of the next layer are 0, so padded lanes never leak into real
      outputs.  The final output width is left untouched.
    * Casts W to `compute_dtype` (default bf16: halves the dominant weight
      HBM->VMEM transfer; f32 MXU accumulation keeps precision).  Bias stays
      f32.  Use compute_dtype=jnp.float32 for bit-exact PyTorch parity.
    """
    n = len(params)
    in_dim = _round_up(params[0][0].shape[0], LANE)
    padded = []
    for i, (w, b) in enumerate(params):
        real_in, real_out = w.shape
        out_pad = real_out if i == n - 1 else _round_up(real_out, LANE)
        w_p = (jnp.zeros((in_dim, out_pad), jnp.float32)
               .at[:real_in, :real_out].set(w))
        b_p = (jnp.zeros((1, out_pad), jnp.float32)
               .at[:, :real_out].set(jnp.asarray(b).reshape(1, -1)))
        padded.append((w_p.astype(compute_dtype), b_p))
        in_dim = out_pad
    return tuple(padded)


# ----------------------------------------------------------------------------
# Tiling heuristics / feature probes
# ----------------------------------------------------------------------------
def _tpu_generation():
    try:
        kind = jax.devices()[0].device_kind.lower()
    except Exception:
        return ""
    for gen in ("v7", "v6", "v5"):
        if gen in kind:
            return gen
    return ""


def _choose_tile_b(batch):
    """Generation-aware batch tiling.

    * batch <= 256: one grid step (no per-step pipeline overhead), except on
      v7x where batch >= 64 is split into 2 steps so both TensorCores get work
      (batch axis is marked 'parallel').
    * batch > 256: 256-row tiles on v6e/v7x (2x256x256 MXU), 128 on v5e
      (4x128x128 MXU; larger tiles only inflate f32 live ranges / spills).
    """
    gen = _tpu_generation()
    if batch <= 256:
        if gen == "v7" and batch >= 64 and batch % 2 == 0:
            return batch // 2
        return batch
    preferred = 256 if gen in ("v6", "v7") else 128
    for t in (preferred, 128, 64, 32, 16, 8):
        if batch % t == 0:
            return t
    return batch


_SINGLE_BUFFER_SUPPORTED = None


def _single_buffer_supported():
    """Probe once whether pipeline_mode=pl.Buffered(1) lowers on this jax/TPU.

    Single-buffering the constant-index weight blocks is a pure VMEM saving;
    if the installed jax rejects it we silently fall back to the default
    (double-buffered) specs, which are still correct.
    """
    global _SINGLE_BUFFER_SUPPORTED
    if _SINGLE_BUFFER_SUPPORTED is not None:
        return _SINGLE_BUFFER_SUPPORTED

    def _copy(x_ref, o_ref):
        o_ref[...] = x_ref[...]

    try:
        spec = pl.BlockSpec((8, LANE), lambda i: (0, 0),
                            pipeline_mode=pl.Buffered(1))
        fn = pl.pallas_call(
            _copy,
            out_shape=jax.ShapeDtypeStruct((8, LANE), jnp.float32),
            grid=(1,),
            in_specs=[spec],
            out_specs=pl.BlockSpec((8, LANE), lambda i: (0, 0)),
        )
        jax.block_until_ready(fn(jnp.zeros((8, LANE), jnp.float32)))
        _SINGLE_BUFFER_SUPPORTED = True
    except Exception:
        _SINGLE_BUFFER_SUPPORTED = False
    return _SINGLE_BUFFER_SUPPORTED


# ----------------------------------------------------------------------------
# Forward
# ----------------------------------------------------------------------------
def ae_decoder_forward(x, prepared_params, *, tile_b=None,
                       gelu_approximate=False):
    """x: [batch, latent_dim] f32; prepared_params from prepare_decoder_params."""
    if tile_b is None:
        tile_b = _choose_tile_b(x.shape[0])
    return _decoder_pallas(x, tuple(prepared_params),
                           tile_b=int(tile_b),
                           gelu_approximate=bool(gelu_approximate),
                           single_buffer_weights=_single_buffer_supported())


@functools.partial(jax.jit, static_argnames=("tile_b", "gelu_approximate",
                                             "single_buffer_weights"))
def _decoder_pallas(x, prepared_params, *, tile_b, gelu_approximate,
                    single_buffer_weights):
    batch, latent = x.shape
    lat_pad = prepared_params[0][0].shape[0]
    output_dim = prepared_params[-1][0].shape[1]
    if batch % tile_b != 0:
        raise ValueError(f"tile_b={tile_b} must divide batch={batch}")
    grid_steps = batch // tile_b

    # Lane-dense LHS for layer 0: zero-pad the latent dim (the matching padded
    # W0 rows are zero, so this is exact).  x is tiny, so this per-call pad is
    # negligible — unlike the weight padding, which is done once at prep time.
    if lat_pad != latent:
        x = jnp.pad(x, ((0, 0), (0, lat_pad - latent)))

    wb_kwargs = {}
    if single_buffer_weights:
        # Constant-index weight/bias blocks never change across grid steps:
        # single-buffer them to halve their VMEM footprint.
        wb_kwargs = dict(pipeline_mode=pl.Buffered(1))

    in_specs = [pl.BlockSpec((tile_b, lat_pad), lambda i: (i, 0))]
    flat_params = []
    for (w, b) in prepared_params:
        flat_params.extend([w, b])
        in_specs.append(pl.BlockSpec(w.shape, lambda i: (0, 0), **wb_kwargs))
        in_specs.append(pl.BlockSpec(b.shape, lambda i: (0, 0), **wb_kwargs))
    out_spec = pl.BlockSpec((tile_b, output_dim), lambda i: (i, 0))

    # Advisory cost estimate so XLA schedules around this small custom call.
    dims = [lat_pad] + [w.shape[1] for (w, _) in prepared_params]
    flops = 2 * batch * sum(dims[i] * dims[i + 1] for i in range(len(dims) - 1))
    transcendentals = batch * sum(dims[1:-1])     # one erf/tanh per hidden elt
    param_bytes = sum(int(w.size) * w.dtype.itemsize
                      + int(b.size) * b.dtype.itemsize
                      for (w, b) in prepared_params)
    bytes_accessed = int(x.size) * 4 + batch * output_dim * 4 + param_bytes

    kernel = functools.partial(_decoder_kernel,
                               gelu_approximate=gelu_approximate)

    # TODO(synk): if this decoder is called inside an outer scan / per-token
    # loop, fold that loop into an extra leading grid axis so the weights are
    # staged into VMEM once per pallas_call instead of once per invocation.
    return pl.pallas_call(
        kernel,
        out_shape=jax.ShapeDtypeStruct((batch, output_dim), jnp.float32),
        grid_spec=pltpu.PrefetchScalarGridSpec(
            num_scalar_prefetch=0,
            grid=(grid_steps,),
            in_specs=in_specs,
            out_specs=out_spec,
        ),
        compiler_params=pltpu.CompilerParams(
            dimension_semantics=("parallel",)),
        cost_estimate=pl.CostEstimate(
            flops=int(flops),
            transcendentals=int(transcendentals),
            bytes_accessed=int(bytes_accessed)),
    )(x, *flat_params)


# ----------------------------------------------------------------------------
# Synthetic params + pure-JAX reference
# ----------------------------------------------------------------------------
def init_params(key, latent_dim=LATENT_DIM, output_dim=OUTPUT_DIM,
                feats=FEATS):
    """Deterministic synthetic params; shapes match the nn.Linear layers."""
    dims = [latent_dim] + list(feats) + [output_dim]
    params = []
    for i in range(len(dims) - 1):
        key, kw, kb = jax.random.split(key, 3)
        fan_in, fan_out = dims[i], dims[i + 1]
        bound = 1.0 / jnp.sqrt(fan_in)
        w = jax.random.uniform(kw, (fan_in, fan_out), jnp.float32,
                               -bound, bound)
        b = jax.random.uniform(kb, (1, fan_out), jnp.float32, -bound, bound)
        params.append((w, b))
    return params


def _reference_forward(x, params):
    h = x
    for i, (w, b) in enumerate(params):
        h = h @ w + b
        if i < len(params) - 1:
            h = jax.nn.gelu(h, approximate=False)
    return h


if __name__ == "__main__":
    key = jax.random.PRNGKey(0)
    key, kx = jax.random.split(key)
    x = jax.random.normal(kx, (BATCH, LATENT_DIM), jnp.float32)
    params = init_params(key)

    y_ref = _reference_forward(x, params)

    # Exact-parity path (f32 weights, exact erf GELU) — matches the PyTorch
    # module.
    p_f32 = prepare_decoder_params(params, compute_dtype=jnp.float32)
    y = jax.block_until_ready(ae_decoder_forward(x, p_f32))
    assert y.shape == (BATCH, OUTPUT_DIM)
    assert jnp.allclose(y, y_ref, atol=1e-4, rtol=1e-4), (
        float(jnp.max(jnp.abs(y - y_ref))))

    # Default fast path: bf16 weights (halves the dominant weight DMA), f32
    # accumulation + f32 exact GELU.  Looser tolerance.
    p_fast = prepare_decoder_params(params)           # bf16 default
    y_fast = jax.block_until_ready(ae_decoder_forward(x, p_fast))
    assert y_fast.shape == (BATCH, OUTPUT_DIM)
    assert jnp.allclose(y_fast, y_ref, atol=5e-2, rtol=5e-2), (
        float(jnp.max(jnp.abs(y_fast - y_ref))))

    # Optional EUP-GELU path (for VALU-bound large tiles on v6e/v7x).
    y_tanh = jax.block_until_ready(
        ae_decoder_forward(x, p_f32, gelu_approximate=True))
    assert jnp.allclose(y_tanh, y_ref, atol=5e-2, rtol=5e-2), (
        float(jnp.max(jnp.abs(y_tanh - y_ref))))

    print("KERNEL_OK")
</pallas_src>

<mosaic_0001>
module attributes {stable_mosaic.version = 11 : i64} {
  func.func @_copy(%arg0: i32, %arg1: memref<8x128xf32, #tpu.memory_space<vmem>>, %arg2: memref<8x128xf32, #tpu.memory_space<vmem>>) attributes {dimension_semantics = [#tpu.dimension_semantics<arbitrary>], iteration_bounds = array<i64: 1>, scalar_prefetch = 0 : i64, scratch_operands = 0 : i64, tpu.core_type = #tpu.core_type<tc>, window_params = [{pipeline_mode = #tpu.pipeline_mode<synchronous>, transform_indices = @transform_0, window_bounds = array<i64: 8, 128>}, {pipeline_mode = #tpu.pipeline_mode<synchronous>, transform_indices = @transform_1, window_bounds = array<i64: 8, 128>}]} {
    %c0 = arith.constant 0 : index
    %c0_0 = arith.constant 0 : index
    %0 = vector.load %arg1[%c0, %c0_0] : memref<8x128xf32, #tpu.memory_space<vmem>>, vector<8x128xf32>
    %c0_1 = arith.constant 0 : index
    %c0_2 = arith.constant 0 : index
    %1 = vector.load %arg2[%c0_1, %c0_2] : memref<8x128xf32, #tpu.memory_space<vmem>>, vector<8x128xf32>
    tpu.vector_store %arg2[%c0_1, %c0_2], %0 {strides = array<i32>} : memref<8x128xf32, #tpu.memory_space<vmem>>, vector<8x128xf32>,
    return
  }
  func.func @transform_0(%arg0: i32) -> (i32, i32) {
    %c0_i32 = arith.constant 0 : i32
    %c0_i32_0 = arith.constant 0 : i32
    %c0_i32_1 = arith.constant 0 : i32
    return %c0_i32, %c0_i32_0 : i32, i32
  }
  func.func @transform_1(%arg0: i32) -> (i32, i32) {
    %c0_i32 = arith.constant 0 : i32
    %c0_i32_0 = arith.constant 0 : i32
    %c0_i32_1 = arith.constant 0 : i32
    return %c0_i32, %c0_i32_0 : i32, i32
  }
}

module attributes {stable_mosaic.version = 11 : i64} {
  func.func @_decoder_kernel(%arg0: i32, %arg1: memref<16x128xf32, #tpu.memory_space<vmem>>, %arg2: memref<128x128xf32, #tpu.memory_space<vmem>>, %arg3: memref<1x128xf32, #tpu.memory_space<vmem>>, %arg4: memref<128x128xf32, #tpu.memory_space<vmem>>, %arg5: memref<1x128xf32, #tpu.memory_space<vmem>>, %arg6: memref<128x128xf32, #tpu.memory_space<vmem>>, %arg7: memref<1x128xf32, #tpu.memory_space<vmem>>, %arg8: memref<128x256xf32, #tpu.memory_space<vmem>>, %arg9: memref<1x256xf32, #tpu.memory_space<vmem>>, %arg10: memref<256x512xf32, #tpu.memory_space<vmem>>, %arg11: memref<1x512xf32, #tpu.memory_space<vmem>>, %arg12: memref<512x128xf32, #tpu.memory_space<vmem>>, %arg13: memref<1x128xf32, #tpu.memory_space<vmem>>, %arg14: memref<16x128xf32, #tpu.memory_space<vmem>>) attributes {dimension_semantics = [#tpu.dimension_semantics<parallel>], iteration_bounds = array<i64: 1>, scalar_prefetch = 0 : i64, scratch_operands = 0 : i64, tpu.core_type = #tpu.core_type<tc>, window_params = [{transform_indices = @transform_0, window_bounds = array<i64: 16, 128>}, {pipeline_mode = #tpu.pipeline_mode<synchronous>, transform_indices = @transform_1, window_bounds = array<i64: 128, 128>}, {pipeline_mode = #tpu.pipeline_mode<synchronous>, transform_indices = @transform_2, window_bounds = array<i64: 1, 128>}, {pipeline_mode = #tpu.pipeline_mode<synchronous>, transform_indices = @transform_3, window_bounds = array<i64: 128, 128>}, {pipeline_mode = #tpu.pipeline_mode<synchronous>, transform_indices = @transform_4, window_bounds = array<i64: 1, 128>}, {pipeline_mode = #tpu.pipeline_mode<synchronous>, transform_indices = @transform_5, window_bounds = array<i64: 128, 128>}, {pipeline_mode = #tpu.pipeline_mode<synchronous>, transform_indices = @transform_6, window_bounds = array<i64: 1, 128>}, {pipeline_mode = #tpu.pipeline_mode<synchronous>, transform_indices = @transform_7, window_bounds = array<i64: 128, 256>}, {pipeline_mode = #tpu.pipeline_mode<synchronous>, transform_indices = @transform_8, window_bounds = array<i64: 1, 256>}, {pipeline_mode = #tpu.pipeline_mode<synchronous>, transform_indices = @transform_9, window_bounds = array<i64: 256, 512>}, {pipeline_mode = #tpu.pipeline_mode<synchronous>, transform_indices = @transform_10, window_bounds = array<i64: 1, 512>}, {pipeline_mode = #tpu.pipeline_mode<synchronous>, transform_indices = @transform_11, window_bounds = array<i64: 512, 128>}, {pipeline_mode = #tpu.pipeline_mode<synchronous>, transform_indices = @transform_12, window_bounds = array<i64: 1, 128>}, {transform_indices = @transform_13, window_bounds = array<i64: 16, 128>}]} {
    %c0 = arith.constant 0 : index
    %c0_0 = arith.constant 0 : index
    %0 = vector.load %arg1[%c0, %c0_0] : memref<16x128xf32, #tpu.memory_space<vmem>>, vector<16x128xf32>
    %c0_1 = arith.constant 0 : index
    %c0_2 = arith.constant 0 : index
    %1 = vector.load %arg2[%c0_1, %c0_2] : memref<128x128xf32, #tpu.memory_space<vmem>>, vector<128x128xf32>
    %cst = arith.constant dense<0.000000e+00> : vector<16x128xf32>
    %2 = tpu.matmul %0, %1, %cst {dimension_numbers = #tpu.dot_dimension_numbers<[1], [0], [0], [1], [0, 0, 1, 1], [], []>} : vector<16x128xf32>, vector<128x128xf32>, vector<16x128xf32> -> vector<16x128xf32>
    %c0_3 = arith.constant 0 : index
    %c0_4 = arith.constant 0 : index
    %3 = vector.load %arg3[%c0_3, %c0_4] : memref<1x128xf32, #tpu.memory_space<vmem>>, vector<1x128xf32>
    %4 = vector.broadcast %3 : vector<1x128xf32> to vector<16x128xf32>
    %5 = arith.addf %2, %4 : vector<16x128xf32>
    %cst_5 = arith.constant 5.000000e-01 : f32
    %6 = vector.broadcast %cst_5 : f32 to vector<16x128xf32>
    %7 = arith.mulf %6, %5 : vector<16x128xf32>
    %cst_6 = arith.constant 0.707106769 : f32
    %8 = vector.broadcast %cst_6 : f32 to vector<16x128xf32>
    %9 = arith.mulf %5, %8 : vector<16x128xf32>
    %10 = math.erf %9 : vector<16x128xf32>
    %cst_7 = arith.constant 1.000000e+00 : f32
    %11 = vector.broadcast %cst_7 : f32 to vector<16x128xf32>
    %12 = arith.addf %11, %10 : vector<16x128xf32>
    %13 = arith.mulf %7, %12 : vector<16x128xf32>
    %c0_8 = arith.constant 0 : index
    %c0_9 = arith.constant 0 : index
    %14 = vector.load %arg4[%c0_8, %c0_9] : memref<128x128xf32, #tpu.memory_space<vmem>>, vector<128x128xf32>
    %cst_10 = arith.constant dense<0.000000e+00> : vector<16x128xf32>
    %15 = tpu.matmul %13, %14, %cst_10 {dimension_numbers = #tpu.dot_dimension_numbers<[1], [0], [0], [1], [0, 0, 1, 1], [], []>} : vector<16x128xf32>, vector<128x128xf32>, vector<16x128xf32> -> vector<16x128xf32>
    %c0_11 = arith.constant 0 : index
    %c0_12 = arith.constant 0 : index
    %16 = vector.load %arg5[%c0_11, %c0_12] : memref<1x128xf32, #tpu.memory_space<vmem>>, vector<1x128xf32>
    %17 = vector.broadcast %16 : vector<1x128xf32> to vector<16x128xf32>
    %18 = arith.addf %15, %17 : vector<16x128xf32>
    %cst_13 = arith.constant 5.000000e-01 : f32
    %19 = vector.broadcast %cst_13 : f32 to vector<16x128xf32>
    %20 = arith.mulf %19, %18 : vector<16x128xf32>
    %cst_14 = arith.constant 0.707106769 : f32
    %21 = vector.broadcast %cst_14 : f32 to vector<16x128xf32>
    %22 = arith.mulf %18, %21 : vector<16x128xf32>
    %23 = math.erf %22 : vector<16x128xf32>
    %cst_15 = arith.constant 1.000000e+00 : f32
    %24 = vector.broadcast %cst_15 : f32 to vector<16x128xf32>
    %25 = arith.addf %24, %23 : vector<16x128xf32>
    %26 = arith.mulf %20, %25 : vector<16x128xf32>
    %c0_16 = arith.constant 0 : index
    %c0_17 = arith.constant 0 : index
    %27 = vector.load %arg6[%c0_16, %c0_17] : memref<128x128xf32, #tpu.memory_space<vmem>>, vector<128x128xf32>
    %cst_18 = arith.constant dense<0.000000e+00> : vector<16x128xf32>
    %28 = tpu.matmul %26, %27, %cst_18 {dimension_numbers = #tpu.dot_dimension_numbers<[1], [0], [0], [1], [0, 0, 1, 1], [], []>} : vector<16x128xf32>, vector<128x128xf32>, vector<16x128xf32> -> vector<16x128xf32>
    %c0_19 = arith.constant 0 : index
    %c0_20 = arith.constant 0 : index
    %29 = vector.load %arg7[%c0_19, %c0_20] : memref<1x128xf32, #tpu.memory_space<vmem>>, vector<1x128xf32>
    %30 = vector.broadcast %29 : vector<1x128xf32> to vector<16x128xf32>
    %31 = arith.addf %28, %30 : vector<16x128xf32>
    %cst_21 = arith.constant 5.000000e-01 : f32
    %32 = vector.broadcast %cst_21 : f32 to vector<16x128xf32>
    %33 = arith.mulf %32, %31 : vector<16x128xf32>
    %cst_22 = arith.constant 0.707106769 : f32
    %34 = vector.broadcast %cst_22 : f32 to vector<16x128xf32>
    %35 = arith.mulf %31, %34 : vector<16x128xf32>
    %36 = math.erf %35 : vector<16x128xf32>
    %cst_23 = arith.constant 1.000000e+00 : f32
    %37 = vector.broadcast %cst_23 : f32 to vector<16x128xf32>
    %38 = arith.addf %37, %36 : vector<16x128xf32>
    %39 = arith.mulf %33, %38 : vector<16x128xf32>
    %c0_24 = arith.constant 0 : index
    %c0_25 = arith.constant 0 : index
    %40 = vector.load %arg8[%c0_24, %c0_25] : memref<128x256xf32, #tpu.memory_space<vmem>>, vector<128x256xf32>
    %cst_26 = arith.constant dense<0.000000e+00> : vector<16x256xf32>
    %41 = tpu.matmul %39, %40, %cst_26 {dimension_numbers = #tpu.dot_dimension_numbers<[1], [0], [0], [1], [0, 0, 1, 1], [], []>} : vector<16x128xf32>, vector<128x256xf32>, vector<16x256xf32> -> vector<16x256xf32>
    %c0_27 = arith.constant 0 : index
    %c0_28 = arith.constant 0 : index
    %42 = vector.load %arg9[%c0_27, %c0_28] : memref<1x256xf32, #tpu.memory_space<vmem>>, vector<1x256xf32>
    %43 = vector.broadcast %42 : vector<1x256xf32> to vector<16x256xf32>
    %44 = arith.addf %41, %43 : vector<16x256xf32>
    %cst_29 = arith.constant 5.000000e-01 : f32
    %45 = vector.broadcast %cst_29 : f32 to vector<16x256xf32>
    %46 = arith.mulf %45, %44 : vector<16x256xf32>
    %cst_30 = arith.constant 0.707106769 : f32
    %47 = vector.broadcast %cst_30 : f32 to vector<16x256xf32>
    %48 = arith.mulf %44, %47 : vector<16x256xf32>
    %49 = math.erf %48 : vector<16x256xf32>
    %cst_31 = arith.constant 1.000000e+00 : f32
    %50 = vector.broadcast %cst_31 : f32 to vector<16x256xf32>
    %51 = arith.addf %50, %49 : vector<16x256xf32>
    %52 = arith.mulf %46, %51 : vector<16x256xf32>
    %c0_32 = arith.constant 0 : index
    %c0_33 = arith.constant 0 : index
    %53 = vector.load %arg10[%c0_32, %c0_33] : memref<256x512xf32, #tpu.memory_space<vmem>>, vector<256x512xf32>
    %cst_34 = arith.constant dense<0.000000e+00> : vector<16x512xf32>
    %54 = tpu.matmul %52, %53, %cst_34 {dimension_numbers = #tpu.dot_dimension_numbers<[1], [0], [0], [1], [0, 0, 1, 1], [], []>} : vector<16x256xf32>, vector<256x512xf32>, vector<16x512xf32> -> vector<16x512xf32>
    %c0_35 = arith.constant 0 : index
    %c0_36 = arith.constant 0 : index
    %55 = vector.load %arg11[%c0_35, %c0_36] : memref<1x512xf32, #tpu.memory_space<vmem>>, vector<1x512xf32>
    %56 = vector.broadcast %55 : vector<1x512xf32> to vector<16x512xf32>
    %57 = arith.addf %54, %56 : vector<16x512xf32>
    %cst_37 = arith.constant 5.000000e-01 : f32
    %58 = vector.broadcast %cst_37 : f32 to vector<16x512xf32>
    %59 = arith.mulf %58, %57 : vector<16x512xf32>
    %cst_38 = arith.constant 0.707106769 : f32
    %60 = vector.broadcast %cst_38 : f32 to vector<16x512xf32>
    %61 = arith.mulf %57, %60 : vector<16x512xf32>
    %62 = math.erf %61 : vector<16x512xf32>
    %cst_39 = arith.constant 1.000000e+00 : f32
    %63 = vector.broadcast %cst_39 : f32 to vector<16x512xf32>
    %64 = arith.addf %63, %62 : vector<16x512xf32>
    %65 = arith.mulf %59, %64 : vector<16x512xf32>
    %c0_40 = arith.constant 0 : index
    %c0_41 = arith.constant 0 : index
    %66 = vector.load %arg12[%c0_40, %c0_41] : memref<512x128xf32, #tpu.memory_space<vmem>>, vector<512x128xf32>
    %cst_42 = arith.constant dense<0.000000e+00> : vector<16x128xf32>
    %67 = tpu.matmul %65, %66, %cst_42 {dimension_numbers = #tpu.dot_dimension_numbers<[1], [0], [0], [1], [0, 0, 1, 1], [], []>} : vector<16x512xf32>, vector<512x128xf32>, vector<16x128xf32> -> vector<16x128xf32>
    %c0_43 = arith.constant 0 : index
    %c0_44 = arith.constant 0 : index
    %68 = vector.load %arg13[%c0_43, %c0_44] : memref<1x128xf32, #tpu.memory_space<vmem>>, vector<1x128xf32>
    %69 = vector.broadcast %68 : vector<1x128xf32> to vector<16x128xf32>
    %70 = arith.addf %67, %69 : vector<16x128xf32>
    %c0_45 = arith.constant 0 : index
    %c0_46 = arith.constant 0 : index
    %71 = vector.load %arg14[%c0_45, %c0_46] : memref<16x128xf32, #tpu.memory_space<vmem>>, vector<16x128xf32>
    tpu.vector_store %arg14[%c0_45, %c0_46], %70 {strides = array<i32>} : memref<16x128xf32, #tpu.memory_space<vmem>>, vector<16x128xf32>,
    return
  }
  func.func @transform_0(%arg0: i32) -> (i32, i32) {
    %c0_i32 = arith.constant 0 : i32
    %c0_i32_0 = arith.constant 0 : i32
    return %arg0, %c0_i32 : i32, i32
  }
  func.func @transform_1(%arg0: i32) -> (i32, i32) {
    %c0_i32 = arith.constant 0 : i32
    %c0_i32_0 = arith.constant 0 : i32
    %c0_i32_1 = arith.constant 0 : i32
    return %c0_i32, %c0_i32_0 : i32, i32
  }
  func.func @transform_2(%arg0: i32) -> (i32, i32) {
    %c0_i32 = arith.constant 0 : i32
    %c0_i32_0 = arith.constant 0 : i32
    %c0_i32_1 = arith.constant 0 : i32
    return %c0_i32, %c0_i32_0 : i32, i32
  }
  func.func @transform_3(%arg0: i32) -> (i32, i32) {
    %c0_i32 = arith.constant 0 : i32
    %c0_i32_0 = arith.constant 0 : i32
    %c0_i32_1 = arith.constant 0 : i32
    return %c0_i32, %c0_i32_0 : i32, i32
  }
  func.func @transform_4(%arg0: i32) -> (i32, i32) {
    %c0_i32 = arith.constant 0 : i32
    %c0_i32_0 = arith.constant 0 : i32
    %c0_i32_1 = arith.constant 0 : i32
    return %c0_i32, %c0_i32_0 : i32, i32
  }
  func.func @transform_5(%arg0: i32) -> (i32, i32) {
    %c0_i32 = arith.constant 0 : i32
    %c0_i32_0 = arith.constant 0 : i32
    %c0_i32_1 = arith.constant 0 : i32
    return %c0_i32, %c0_i32_0 : i32, i32
  }
  func.func @transform_6(%arg0: i32) -> (i32, i32) {
    %c0_i32 = arith.constant 0 : i32
    %c0_i32_0 = arith.constant 0 : i32
    %c0_i32_1 = arith.constant 0 : i32
    return %c0_i32, %c0_i32_0 : i32, i32
  }
  func.func @transform_7(%arg0: i32) -> (i32, i32) {
    %c0_i32 = arith.constant 0 : i32
    %c0_i32_0 = arith.constant 0 : i32
    %c0_i32_1 = arith.constant 0 : i32
    return %c0_i32, %c0_i32_0 : i32, i32
  }
  func.func @transform_8(%arg0: i32) -> (i32, i32) {
    %c0_i32 = arith.constant 0 : i32
    %c0_i32_0 = arith.constant 0 : i32
    %c0_i32_1 = arith.constant 0 : i32
    return %c0_i32, %c0_i32_0 : i32, i32
  }
  func.func @transform_9(%arg0: i32) -> (i32, i32) {
    %c0_i32 = arith.constant 0 : i32
    %c0_i32_0 = arith.constant 0 : i32
    %c0_i32_1 = arith.constant 0 : i32
    return %c0_i32, %c0_i32_0 : i32, i32
  }
  func.func @transform_10(%arg0: i32) -> (i32, i32) {
    %c0_i32 = arith.constant 0 : i32
    %c0_i32_0 = arith.constant 0 : i32
    %c0_i32_1 = arith.constant 0 : i32
    return %c0_i32, %c0_i32_0 : i32, i32
  }
  func.func @transform_11(%arg0: i32) -> (i32, i32) {
    %c0_i32 = arith.constant 0 : i32
    %c0_i32_0 = arith.constant 0 : i32
    %c0_i32_1 = arith.constant 0 : i32
    return %c0_i32, %c0_i32_0 : i32, i32
  }
  func.func @transform_12(%arg0: i32) -> (i32, i32) {
    %c0_i32 = arith.constant 0 : i32
    %c0_i32_0 = arith.constant 0 : i32
    %c0_i32_1 = arith.constant 0 : i32
    return %c0_i32, %c0_i32_0 : i32, i32
  }
  func.func @transform_13(%arg0: i32) -> (i32, i32) {
    %c0_i32 = arith.constant 0 : i32
    %c0_i32_0 = arith.constant 0 : i32
    return %arg0, %c0_i32 : i32, i32
  }
}

</mosaic_0001>

<bundles_post_ra>
// kernel: tpu_custom_call.1
= control target key start
LH: loop header
LB: loop body
LE: loop exit
PB: predicated region body
PF: predicated region fallthrough
CT: control target
= control target key end

     0   :  { %6 = vsyncpa [#allocation3], 0  ;;  %s124_s0 = inlined_call_operand.hbm [shape: f32[8,128], index: 0, kind: input, shape index: {}]   ;;  %s125_s1 = inlined_call_operand.hbm [shape: f32[8,128], index: 1, kind: output, shape index: {}]  }
   0x1   :  { %7 = vsyncpa [#allocation4], 0  ;;  %s88_s6 = smov [#allocation2]   ;;  %s40_s10 = scalar_lea.hbm %s124_s0, 128 }
   0x2   :  { %s14_s7 = sshll.u32 %s88_s6, 4  ;;  %p41_p0 = scmp.ne.s32.totalorder %s124_s0, %s40_s10  ;;  %s15_s7 = int_to_ptr.vmem [resolvable:$true] %s14_s7 }
   0x3   :  { %p44_p1 = scmp.lt.u32.totalorder %s40_s10, %s124_s0 }
   0x5   :  { %p46_p2 = pnand %p44_p1, %p41_p0 }
   0x7   :  { %49 = shalt.err (!%p46_p2)
}
   0x8   :  { %s50_s15 = scalar_lea.vmem %s15_s7, 128  ;;  %p55_p4 = scmp.lt.s32.totalorder %s15_s7, %s15_s7 }
   0x9   :  { %p51_p3 = scmp.ne.s32.totalorder %s15_s7, %s50_s15  ;;  %p56_p5 = scmp.lt.s32.totalorder %s50_s15, %s50_s15 }
   0xb   :  { %p57_p6 = por %p56_p5, %p55_p4 }
   0xd   :  { %p58_p7 = pnand %p57_p6, %p51_p3 }
   0xf   :  { %61 = shalt.err (!%p58_p7)
}
  0x10   :  { %17 = dma.hbm_to_vmem [thread:$0]  %s124_s0, 128, %s15_s7, [#allocation3]  }
  0x11   :  { %84 = dma.done.wait [#allocation3], 128  }
  0x12   :  { %85 = vsyncadd [#allocation3], 4294967168  ;;  %s89_s18 = smov [#allocation5]   ;;  %v21_v0 = vld [vmem:[#allocation2] sm:$0xff] }
  0x13   :  { %s29_s19 = sshll.u32 %s89_s18, 4  ;;  %22 = vst [vmem:[#allocation5] sm:$0xff] %v21_v0  ;;  %s30_s19 = int_to_ptr.vmem [resolvable:$true] %s29_s19 }
  0x14   :  { %s62_s20 = scalar_lea.vmem %s30_s19, 128  ;;  %p67_p9 = scmp.lt.s32.totalorder %s30_s19, %s30_s19 }
  0x15   :  { %p63_p8 = scmp.ne.s32.totalorder %s30_s19, %s62_s20  ;;  %p68_p10 = scmp.lt.s32.totalorder %s62_s20, %s62_s20 }
  0x17   :  { %p69_p11 = por %p68_p10, %p67_p9 }
  0x19   :  { %p70_p12 = pnand %p69_p11, %p63_p8 }
  0x1b   :  { %73 = shalt.err (!%p70_p12)
}
  0x1c   :  { %s74_s23 = scalar_lea.hbm %s125_s1, 128 }
  0x1d   :  { %p75_p13 = scmp.ne.s32.totalorder %s125_s1, %s74_s23  ;;  %p78_p0 = scmp.lt.u32.totalorder %s74_s23, %s125_s1 }
  0x1f   :  { %p80_p1 = pnand %p78_p0, %p75_p13 }
  0x21   :  { %83 = shalt.err (!%p80_p1)
}
  0x22   :  { %32 = dma.vmem_to_hbm [thread:$0]  %s30_s19, 128, %s125_s1, [#allocation4]  }
  0x23   :  { %86 = dma.done.wait [#allocation4], 128  }
  0x24   :  { %87 = vsyncadd [#allocation4], 4294967168 }
  0x25   :  { %36 = vsyncpa [#allocation3], 1 }
  0x26   :  { %37 = vsyncpa [#allocation4], 1 }

// kernel: _decoder_pallas.1
= control target key start
LH: loop header
LB: loop body
LE: loop exit
PB: predicated region body
PF: predicated region fallthrough
CT: control target
= control target key end

     0   :  { %18 = vsyncpa [#allocation3], 0  ;;  %s2191_s0 = inlined_call_operand.vmem [shape: f32[16,128], index: 0, kind: input, shape index: {}]   ;;  %s2192_s1 = inlined_call_operand.hbm [shape: f32[128,128], index: 1, kind: input, shape index: {}]   ;;  %s2193_s2 = inlined_call_operand.vmem [shape: f32[1,128], index: 2, kind: input, shape index: {}]   ;;  %s2194_s3 = inlined_call_operand.hbm [shape: f32[128,128], index: 3, kind: input, shape index: {}]   ;;  %s2195_s4 = inlined_call_operand.vmem [shape: f32[1,128], index: 4, kind: input, shape index: {}]   ;;  %s2196_s5 = inlined_call_operand.hbm [shape: f32[128,128], index: 5, kind: input, shape index: {}]   ;;  %s2197_s6 = inlined_call_operand.vmem [shape: f32[1,128], index: 6, kind: input, shape index: {}]   ;;  %s2198_s7 = inlined_call_operand.hbm [shape: f32[128,256], index: 7, kind: input, shape index: {}]   ;;  %s2199_s8 = inlined_call_operand.vmem [shape: f32[1,256], index: 8, kind: input, shape index: {}]   ;;  %s2200_s9 = inlined_call_operand.hbm [shape: f32[256,512], index: 9, kind: input, shape index: {}]   ;;  %s2201_s10 = inlined_call_operand.vmem [shape: f32[1,512], index: 10, kind: input, shape index: {}]   ;;  %s2202_s11 = inlined_call_operand.hbm [shape: f32[512,128], index: 11, kind: input, shape index: {}]   ;;  %s2203_s12 = inlined_call_operand.vmem [shape: f32[1,128], index: 12, kind: input, shape index: {}]   ;;  %s2204_s13 = inlined_call_operand.hbm [shape: f32[16,128], index: 13, kind: output, shape index: {}]  }
   0x1   :  { %19 = vsyncpa [#allocation6], 0 }
   0x2   :  { %20 = vsyncpa [#allocation9], 0 }
   0x3   :  { %21 = vsyncpa [#allocation12], 0 }
   0x4   :  { %22 = vsyncpa [#allocation4], 0  ;;  %s1954_s25 = smov [#allocation5]   ;;  %s1955_s27 = smov [#allocation8]  }
   0x5   :  { %s44_s26 = sshll.u32 %s1954_s25, 4  ;;  %s72_s28 = sshll.u32 %s1955_s27, 4  ;;  %s45_s26 = int_to_ptr.vmem [resolvable:$true] %s44_s26  ;;  %s2038_s28 = int_to_ptr.vmem [resolvable:$true] %s72_s28 }
   0x6   :  { %s1790_s14 = scalar_lea.hbm %s2194_s3, 2048 }
   0x7   :  { %p1791_p0 = scmp.ne.s32.totalorder %s2194_s3, %s1790_s14  ;;  %p1794_p1 = scmp.lt.u32.totalorder %s1790_s14, %s2194_s3 }
   0x9   :  { %p1796_p2 = pnand %p1794_p1, %p1791_p0 }
   0xb   :  { %1799 = shalt.err (!%p1796_p2)
}
   0xc   :  { %s1800_s19 = scalar_lea.vmem %s45_s26, 2048  ;;  %p1805_p4 = scmp.lt.s32.totalorder %s45_s26, %s45_s26 }
   0xd   :  { %p1801_p3 = scmp.ne.s32.totalorder %s45_s26, %s1800_s19  ;;  %p1806_p5 = scmp.lt.s32.totalorder %s1800_s19, %s1800_s19 }
   0xf   :  { %p1807_p6 = por %p1806_p5, %p1805_p4 }
  0x11   :  { %p1808_p7 = pnand %p1807_p6, %p1801_p3 }
  0x13   :  { %1811 = shalt.err (!%p1808_p7)
}
  0x14   :  { %s1956_s20 = smov 128   ;;  %s1957_s21 = smov 8  }
  0x15   :  { %50 = dma.hbm_to_vmem [thread:$0]  %s2194_s3, 2048, %s45_s26, [#allocation6], %s1956_s20, %s1956_s20, %s1957_s21  }
  0x16   :  { %s1812_s27 = scalar_lea.hbm %s2198_s7, 4096 }
  0x17   :  { %p1813_p8 = scmp.ne.s32.totalorder %s2198_s7, %s1812_s27  ;;  %p1816_p9 = scmp.lt.u32.totalorder %s1812_s27, %s2198_s7 }
  0x19   :  { %p1818_p10 = pnand %p1816_p9, %p1813_p8 }
  0x1b   :  { %1821 = shalt.err (!%p1818_p10)
}
  0x1c   :  { %s1822_s16 = scalar_lea.vmem %s2038_s28, 4096  ;;  %p1827_p12 = scmp.lt.s32.totalorder %s2038_s28, %s2038_s28 }
  0x1d   :  { %p1823_p11 = scmp.ne.s32.totalorder %s2038_s28, %s1822_s16  ;;  %p1828_p13 = scmp.lt.s32.totalorder %s1822_s16, %s1822_s16 }
  0x1f   :  { %p1829_p0 = por %p1828_p13, %p1827_p12 }
  0x21   :  { %p1830_p1 = pnand %p1829_p0, %p1823_p11 }
  0x23   :  { %1833 = shalt.err (!%p1830_p1)
}
  0x24   :  { %s1958_s3 = smov 256   ;;  %s1959_s26 = smov 16  }
  0x25   :  { %78 = dma.hbm_to_vmem [thread:$0]  %s2198_s7, 4096, %s2038_s28, [#allocation9], %s1958_s3, %s1958_s3, %s1959_s26  }
  0x26   :  { %s1960_s19 = smov [#allocation2]   ;;  %s1961_s23 = smov [#allocation7]  }
  0x27   :  { %s30_s22 = sshll.u32 %s1960_s19, 4  ;;  %s58_s24 = sshll.u32 %s1961_s23, 4  ;;  %s31_s22 = int_to_ptr.vmem [resolvable:$true] %s30_s22  ;;  %s2072_s24 = int_to_ptr.vmem [resolvable:$true] %s58_s24 }
  0x28   :  { %s1834_s29 = scalar_lea.hbm %s2192_s1, 2048 }
  0x29   :  { %p1835_p2 = scmp.ne.s32.totalorder %s2192_s1, %s1834_s29  ;;  %p1838_p3 = scmp.lt.u32.totalorder %s1834_s29, %s2192_s1 }
  0x2b   :  { %p1840_p4 = pnand %p1838_p3, %p1835_p2 }
  0x2d   :  { %1843 = shalt.err (!%p1840_p4)
}
  0x2e   :  { %s1844_s7 = scalar_lea.vmem %s31_s22, 2048  ;;  %p1849_p6 = scmp.lt.s32.totalorder %s31_s22, %s31_s22 }
  0x2f   :  { %p1845_p5 = scmp.ne.s32.totalorder %s31_s22, %s1844_s7  ;;  %p1850_p7 = scmp.lt.s32.totalorder %s1844_s7, %s1844_s7 }
  0x31   :  { %p1851_p8 = por %p1850_p7, %p1849_p6 }
  0x33   :  { %p1852_p9 = pnand %p1851_p8, %p1845_p5 }
  0x35   :  { %1855 = shalt.err (!%p1852_p9)
}
  0x36   :  { %36 = dma.hbm_to_vmem [thread:$0]  %s2192_s1, 2048, %s31_s22, [#allocation3], %s1956_s20, %s1956_s20, %s1957_s21  }
  0x37   :  { %s1856_s18 = scalar_lea.hbm %s2196_s5, 2048 }
  0x38   :  { %p1857_p10 = scmp.ne.s32.totalorder %s2196_s5, %s1856_s18  ;;  %p1860_p11 = scmp.lt.u32.totalorder %s1856_s18, %s2196_s5 }
  0x3a   :  { %p1862_p12 = pnand %p1860_p11, %p1857_p10 }
  0x3c   :  { %1865 = shalt.err (!%p1862_p12)
}
  0x3d   :  { %s1866_s29 = scalar_lea.vmem %s2072_s24, 2048  ;;  %p1871_p0 = scmp.lt.s32.totalorder %s2072_s24, %s2072_s24 }
  0x3e   :  { %p1867_p13 = scmp.ne.s32.totalorder %s2072_s24, %s1866_s29  ;;  %p1872_p1 = scmp.lt.s32.totalorder %s1866_s29, %s1866_s29 }
  0x40   :  { %p1873_p2 = por %p1872_p1, %p1871_p0 }
  0x42   :  { %p1874_p3 = pnand %p1873_p2, %p1867_p13 }
  0x44   :  { %1877 = shalt.err (!%p1874_p3)
}
  0x45   :  { %64 = dma.hbm_to_vmem [thread:$0]  %s2196_s5, 2048, %s2072_s24, [#allocation6], %s1956_s20, %s1956_s20, %s1957_s21  }
  0x46   :  { %s1962_s30 = smov [#allocation10]   ;;  %s1878_s7 = scalar_lea.hbm %s2200_s9, 16384 }
  0x47   :  { %s86_s14 = sshll.u32 %s1962_s30, 4  ;;  %p1879_p4 = scmp.ne.s32.totalorder %s2200_s9, %s1878_s7  ;;  %s87_s14 = int_to_ptr.vmem [resolvable:$true] %s86_s14 }
  0x48   :  { %p1882_p5 = scmp.lt.u32.totalorder %s1878_s7, %s2200_s9 }
  0x4a   :  { %p1884_p6 = pnand %p1882_p5, %p1879_p4 }
  0x4c   :  { %1887 = shalt.err (!%p1884_p6)
}
  0x4d   :  { %s1888_s18 = scalar_lea.vmem %s87_s14, 16384  ;;  %p1893_p8 = scmp.lt.s32.totalorder %s87_s14, %s87_s14 }
  0x4e   :  { %p1889_p7 = scmp.ne.s32.totalorder %s87_s14, %s1888_s18  ;;  %p1894_p9 = scmp.lt.s32.totalorder %s1888_s18, %s1888_s18 }
  0x50   :  { %p1895_p10 = por %p1894_p9, %p1893_p8 }
  0x52   :  { %p1896_p11 = pnand %p1895_p10, %p1889_p7 }
  0x54   :  { %1899 = shalt.err (!%p1896_p11)
}
  0x55   :  { %s1963_s5 = smov 512   ;;  %s1964_s24 = smov 32  }
  0x56   :  { %92 = dma.hbm_to_vmem [thread:$0]  %s2200_s9, 16384, %s87_s14, [#allocation9], %s1963_s5, %s1963_s5, %s1964_s24  }
  0x57   :  { %s1965_s25 = smov [#allocation11]   ;;  %s1900_s22 = scalar_lea.hbm %s2202_s11, 8192 }
  0x58   :  { %s100_s27 = sshll.u32 %s1965_s25, 4  ;;  %p1901_p12 = scmp.ne.s32.totalorder %s2202_s11, %s1900_s22  ;;  %s101_s27 = int_to_ptr.vmem [resolvable:$true] %s100_s27 }
  0x59   :  { %p1904_p13 = scmp.lt.u32.totalorder %s1900_s22, %s2202_s11 }
  0x5b   :  { %p1906_p0 = pnand %p1904_p13, %p1901_p12 }
  0x5d   :  { %1909 = shalt.err (!%p1906_p0)
}
  0x5e   :  { %s1910_s28 = scalar_lea.vmem %s101_s27, 8192  ;;  %p1915_p2 = scmp.lt.s32.totalorder %s101_s27, %s101_s27 }
  0x5f   :  { %p1911_p1 = scmp.ne.s32.totalorder %s101_s27, %s1910_s28  ;;  %p1916_p3 = scmp.lt.s32.totalorder %s1910_s28, %s1910_s28 }
  0x61   :  { %p1917_p4 = por %p1916_p3, %p1915_p2 }
  0x63   :  { %p1918_p5 = pnand %p1917_p4, %p1911_p1 }
  0x65   :  { %1921 = shalt.err (!%p1918_p5)
}
  0x66   :  { %106 = dma.hbm_to_vmem [thread:$0]  %s2202_s11, 8192, %s101_s27, [#allocation12], %s1956_s20, %s1956_s20, %s1957_s21  }
  0x67   :  { %1944 = dma.done.wait [#allocation3], 2048  }
  0x68   :  { %1945 = vsyncadd [#allocation3], 4294965248 }
  0x69   :  { %1946 = dma.done.wait [#allocation6], 4096  }
  0x6a   :  { %1947 = vsyncadd [#allocation6], 4294963200 }
  0x6b   :  { %1948 = dma.done.wait [#allocation9], 20480  }
  0x6c   :  { %1949 = vsyncadd [#allocation9], 4294946816 }
  0x6d   :  { %1950 = dma.done.wait [#allocation12], 8192  }
  0x6e   :  { %1951 = vsyncadd [#allocation12], 4294959104  ;;  %v129_v0 = vld [vmem:[#allocation2] sm:$0xff]  ;;  %v130_v1 = vld [vmem:[#allocation2 + $0x8] sm:$0xff]  ;;  %s1967_s27 = smov [#allocation13]  }
  0x6f   :  { %v131_v2 = vld [vmem:[#allocation2 + $0x10] sm:$0xff]  ;;  %v1420_v3 = vpack.c.bf16 %v130_v1, %v129_v0  ;;  %v132_v4 = vld [vmem:[#allocation2 + $0x18] sm:$0xff]  ;;  %v133_v6 = vld [vmem:[#allocation2 + $0x20] sm:$0xff]  ;;  %s1166_s29 = sshll.u32 %s1967_s27, 4  ;;  %s1167_s29 = int_to_ptr.vmem [resolvable:$true] %s1166_s29 }
  0x70   :  { %v1424_v5 = vpack.c.bf16 %v132_v4, %v131_v2  ;;  %v134_v7 = vld [vmem:[#allocation2 + $0x28] sm:$0xff]  ;;  %v135_v9 = vld [vmem:[#allocation2 + $0x30] sm:$0xff]  ;;  %v136_v10 = vld [vmem:[#allocation2 + $0x38] sm:$0xff]  ;;  %p1927_p7 = scmp.lt.s32.totalorder %s1167_s29, %s1167_s29 }
  0x71   :  { %1421 = vmatprep.subr.bf16.mxu0 %v1420_v3  ;;  %v1428_v8 = vpack.c.bf16 %v134_v7, %v133_v6  ;;  %v127_v11 = vld [vmem:[%s2191_s0] sm:$0xff]  ;;  %v238_v13 = vld [vmem:[#allocation5 + $0x8] sm:$0xff]  ;;  %v239_v14 = vld [vmem:[#allocation5 + $0x10] sm:$0xff]  ;;  %v1432_v20 = vpack.c.bf16 %v136_v10, %v135_v9 }
  0x72   :  { %1423 = vmatpush3.bf16.msra.mxu0 %v1420_v3  ;;  %1347 = vmatprep.mubr.f32.mxu0 %v127_v11  ;;  %v237_v12 = vld [vmem:[#allocation5] sm:$0xff]  ;;  %v240_v16 = vld [vmem:[#allocation5 + $0x18] sm:$0xff]  ;;  %v242_v19 = vld [vmem:[#allocation5 + $0x28] sm:$0xff] }
  0x73   :  { %1425 = vmatprep.subr.bf16.mxu0 %v1424_v5  ;;  %v1452_v15 = vpack.c.bf16 %v238_v13, %v237_v12  ;;  %v1456_v17 = vpack.c.bf16 %v240_v16, %v239_v14  ;;  %v241_v18 = vld [vmem:[#allocation5 + $0x20] sm:$0xff]  ;;  %v138_v22 = vld [vmem:[#allocation2 + $0x48] sm:$0xff]  ;;  %v139_v25 = vld [vmem:[#allocation2 + $0x50] sm:$0xff] }
  0x74   :  { %v137_v21 = vld [vmem:[#allocation2 + $0x40] sm:$0xff]  ;;  %v1460_v23 = vpack.c.bf16 %v242_v19, %v241_v18  ;;  %v140_v26 = vld [vmem:[#allocation2 + $0x58] sm:$0xff]  ;;  %v142_v29 = vld [vmem:[#allocation2 + $0x68] sm:$0xff] }
  0x75   :  { %1453 = vmatprep.subr.bf16.mxu1 %v1452_v15  ;;  %v1436_v24 = vpack.c.bf16 %v138_v22, %v137_v21  ;;  %v1440_v27 = vpack.c.bf16 %v140_v26, %v139_v25  ;;  %v141_v28 = vld [vmem:[#allocation2 + $0x60] sm:$0xff]  ;;  %v143_v31 = vld [vmem:[#allocation2 + $0x70] sm:$0xff]  ;;  %v144_v32 = vld [vmem:[#allocation2 + $0x78] sm:$0xff] }
  0x76   :  { %1427 = vmatpush3.bf16.msra.mxu0 %v1424_v5  ;;  %1455 = vmatpush3.bf16.msra.mxu1 %v1452_v15  ;;  %v1444_v30 = vpack.c.bf16 %v142_v29, %v141_v28  ;;  %v1448_v33 = vpack.c.bf16 %v144_v32, %v143_v31  ;;  %v128_v34 = vld [vmem:[%s2191_s0 + $0x8] sm:$0xff]  ;;  %v243_v35 = vld [vmem:[#allocation5 + $0x30] sm:$0xff]  ;;  %v244_v36 = vld [vmem:[#allocation5 + $0x38] sm:$0xff] }
  0x77   :  { %1429 = vmatprep.subr.bf16.mxu0 %v1428_v8  ;;  %1457 = vmatprep.subr.bf16.mxu1 %v1456_v17  ;;  %v1464_v37 = vpack.c.bf16 %v244_v36, %v243_v35  ;;  %v245_v38 = vld [vmem:[#allocation5 + $0x40] sm:$0xff]  ;;  %v246_v39 = vld [vmem:[#allocation5 + $0x48] sm:$0xff]  ;;  %v247_v41 = vld [vmem:[#allocation5 + $0x50] sm:$0xff] }
  0x78   :  { %v1468_v40 = vpack.c.bf16 %v246_v39, %v245_v38  ;;  %v248_v42 = vld [vmem:[#allocation5 + $0x58] sm:$0xff]  ;;  %v249_v44 = vld [vmem:[#allocation5 + $0x60] sm:$0xff]  ;;  %v250_v45 = vld [vmem:[#allocation5 + $0x68] sm:$0xff] }
  0x79   :  { %v1472_v43 = vpack.c.bf16 %v248_v42, %v247_v41  ;;  %v1476_v46 = vpack.c.bf16 %v250_v45, %v249_v44  ;;  %v251_v47 = vld [vmem:[#allocation5 + $0x70] sm:$0xff]  ;;  %v252_v48 = vld [vmem:[#allocation5 + $0x78] sm:$0xff]  ;;  %v345_v50 = vld [vmem:[#allocation7] sm:$0xff] }
  0x7a   :  { %1431 = vmatpush3.bf16.msra.mxu0 %v1428_v8  ;;  %1459 = vmatpush3.bf16.msra.mxu1 %v1456_v17  ;;  %v1480_v49 = vpack.c.bf16 %v252_v48, %v251_v47  ;;  %v346_v51 = vld [vmem:[#allocation7 + $0x8] sm:$0xff]  ;;  %v347_v52 = vld [vmem:[#allocation7 + $0x10] sm:$0xff]  ;;  %v348_v54 = vld [vmem:[#allocation7 + $0x18] sm:$0xff] }
  0x7b   :  { %1433 = vmatprep.subr.bf16.mxu0 %v1432_v20  ;;  %1461 = vmatprep.subr.bf16.mxu1 %v1460_v23  ;;  %v1484_v53 = vpack.c.bf16 %v346_v51, %v345_v50  ;;  %v1488_v55 = vpack.c.bf16 %v348_v54, %v347_v52  ;;  %v349_v56 = vld [vmem:[#allocation7 + $0x20] sm:$0xff]  ;;  %v350_v57 = vld [vmem:[#allocation7 + $0x28] sm:$0xff]  ;;  %v351_v10 = vld [vmem:[#allocation7 + $0x30] sm:$0xff] }
  0x7c   :  { %v1492_v58 = vpack.c.bf16 %v350_v57, %v349_v56  ;;  %v1181_v59 = vld [vmem:[%s2193_s2] ss:$0 sm:$0xff]  ;;  %v352_v11 = vld [vmem:[#allocation7 + $0x38] sm:$0xff]  ;;  %v354_v14 = vld [vmem:[#allocation7 + $0x48] sm:$0xff] }
  0x7d   :  { %v1496_v12 = vpack.c.bf16 %v352_v11, %v351_v10  ;;  %v353_v13 = vld [vmem:[#allocation7 + $0x40] sm:$0xff]  ;;  %v355_v16 = vld [vmem:[#allocation7 + $0x50] sm:$0xff]  ;;  %v356_v17 = vld [vmem:[#allocation7 + $0x58] sm:$0xff] }
  0x7e   :  { %1435 = vmatpush3.bf16.msra.mxu0 %v1432_v20  ;;  %1463 = vmatpush3.bf16.msra.mxu1 %v1460_v23  ;;  %v1500_v15 = vpack.c.bf16 %v354_v14, %v353_v13  ;;  %v1504_v18 = vpack.c.bf16 %v356_v17, %v355_v16  ;;  %v357_v19 = vld [vmem:[#allocation7 + $0x60] sm:$0xff]  ;;  %v358_v20 = vld [vmem:[#allocation7 + $0x68] sm:$0xff]  ;;  %v359_v22 = vld [vmem:[#allocation7 + $0x70] sm:$0xff] }
  0x7f   :  { %1437 = vmatprep.subr.bf16.mxu0 %v1436_v24  ;;  %1465 = vmatprep.subr.bf16.mxu1 %v1464_v37  ;;  %v1508_v21 = vpack.c.bf16 %v358_v20, %v357_v19  ;;  %v360_v23 = vld [vmem:[#allocation7 + $0x78] sm:$0xff]  ;;  %v454_v25 = vld [vmem:[#allocation8 + $0x8] sm:$0xff]  ;;  %v455_v29 = vld [vmem:[#allocation8 + $0x10] sm:$0xff] }
  0x80   :  { %v456_v26 = vld [vmem:[#allocation8 + $0x18] sm:$0xff]  ;;  %v459_v35 = vld [vmem:[#allocation8 + $0x30] sm:$0xff]  ;;  %v462_v36 = vld [vmem:[#allocation8 + $0x48] sm:$0xff] }
  0x81   :  { %v1516_v28 = vpack.c.bf16 %v456_v26, %v454_v25  ;;  %v460_v31 = vld [vmem:[#allocation8 + $0x38] sm:$0xff]  ;;  %v463_v41 = vld [vmem:[#allocation8 + $0x50] sm:$0xff]  ;;  %v595_v25 = vld [vmem:[#allocation10 + $0x8] sm:$0xff] }
  0x82   :  { %1439 = vmatpush3.bf16.msra.mxu0 %v1436_v24  ;;  %1467 = vmatpush3.bf16.msra.mxu1 %v1464_v37  ;;  %v1512_v24 = vpack.c.bf16 %v360_v23, %v359_v22  ;;  %v464_v37 = vld [vmem:[#allocation8 + $0x58] sm:$0xff]  ;;  %v475_v10 = vld [vmem:[#allocation8 + $0xb0] sm:$0xff]  ;;  %v599_v26 = vld [vmem:[#allocation10 + $0x28] sm:$0xff] }
  0x83   :  { %1441 = vmatprep.subr.bf16.mxu0 %v1440_v27  ;;  %1469 = vmatprep.subr.bf16.mxu1 %v1468_v40  ;;  %v1524_v39 = vpack.c.bf16 %v464_v37, %v462_v36  ;;  %v480_v13 = vld [vmem:[#allocation8 + $0xd8] sm:$0xff]  ;;  %v479_v16 = vld [vmem:[#allocation8 + $0xd0] sm:$0xff]  ;;  %v602_v37 = vld [vmem:[#allocation10 + $0x40] sm:$0xff] }
  0x84   :  { %v484_v19 = vld [vmem:[#allocation8 + $0xf8] sm:$0xff]  ;;  %v483_v22 = vld [vmem:[#allocation8 + $0xf0] sm:$0xff] }
  0x86   :  { %1443 = vmatpush3.bf16.msra.mxu0 %v1440_v27  ;;  %1471 = vmatpush3.bf16.msra.mxu1 %v1468_v40  ;;  %v453_v27 = vld [vmem:[#allocation8] sm:$0xff] }
  0x87   :  { %1445 = vmatprep.subr.bf16.mxu0 %v1444_v30  ;;  %1473 = vmatprep.subr.bf16.mxu1 %v1472_v43  ;;  %v1518_v32 = vpack.c.bf16 %v455_v29, %v453_v27  ;;  %v461_v40 = vld [vmem:[#allocation8 + $0x40] sm:$0xff]  ;;  %v597_v27 = vld [vmem:[#allocation10 + $0x18] sm:$0xff] }
  0x88   :  { %v1526_v42 = vpack.c.bf16 %v463_v41, %v461_v40  ;;  %v601_v29 = vld [vmem:[#allocation10 + $0x38] sm:$0xff]  ;;  %v611_v40 = vld [vmem:[#allocation10 + $0x88] sm:$0xff] }
  0x89   :  { %v615_v41 = vld [vmem:[#allocation10 + $0xa8] sm:$0xff] }
  0x8a   :  { %1447 = vmatpush3.bf16.msra.mxu0 %v1444_v30  ;;  %1475 = vmatpush3.bf16.msra.mxu1 %v1472_v43  ;;  %v458_v30 = vld [vmem:[#allocation8 + $0x28] sm:$0xff]  ;;  %v1182_v43 = vld [vmem:[%s2195_s4] ss:$0 sm:$0xff] }
  0x8b   :  { %1449 = vmatprep.subr.bf16.mxu0 %v1448_v33  ;;  %1477 = vmatprep.subr.bf16.mxu1 %v1476_v46 }
  0x8e   :  { %1451 = vmatpush3.bf16.msra.mxu0 %v1448_v33  ;;  %1479 = vmatpush3.bf16.msra.mxu1 %v1476_v46  ;;  %v1520_v33 = vpack.c.bf16 %v460_v31, %v458_v30  ;;  %v594_v30 = vld [vmem:[#allocation10] sm:$0xff] }
  0x8f   :  { %1481 = vmatprep.subr.bf16.mxu1 %v1480_v49  ;;  %1485 = vmatprep.subr.bf16.mxu0 %v1484_v53  ;;  %v598_v31 = vld [vmem:[#allocation10 + $0x20] sm:$0xff] }
  0x91   :  { %1348 = vmatmul.mubr.f32.vlgmr.msra.gmra.mrb[0].mxu0 %v128_v34  ;;  %v457_v34 = vld [vmem:[#allocation8 + $0x20] sm:$0xff] }
  0x92   :  { %1483 = vmatpush3.bf16.msra.mxu1 %v1480_v49  ;;  %1487 = vmatpush3.bf16.msra.mxu0 %v1484_v53  ;;  %v1522_v38 = vpack.c.bf16 %v459_v35, %v457_v34  ;;  %v603_v34 = vld [vmem:[#allocation10 + $0x48] sm:$0xff] }
  0x93   :  { %1489 = vmatprep.subr.bf16.mxu0 %v1488_v55  ;;  %1517 = vmatprep.subr.bf16.mxu1 %v1516_v28  ;;  %v1548_v28 = vpack.c.bf16 %v599_v26, %v595_v25  ;;  %v607_v35 = vld [vmem:[#allocation10 + $0x68] sm:$0xff] }
  0x94   :  { %v1552_v36 = vpack.c.bf16 %v607_v35, %v603_v34  ;;  %v679_v25 = vld [vmem:[#allocation10 + $0x2a8] sm:$0xff] }
  0x96   :  { %1491 = vmatpush3.bf16.msra.mxu0 %v1488_v55 }
  0x97   :  { %1493 = vmatprep.subr.bf16.mxu0 %v1492_v58 }
  0x9a   :  { %1495 = vmatpush3.bf16.msra.mxu0 %v1492_v58  ;;  %v466_v58 = vld [vmem:[#allocation8 + $0x68] sm:$0xff] }
  0x9b   :  { %1497 = vmatprep.subr.bf16.mxu0 %v1496_v12 }
  0x9e   :  { %1499 = vmatpush3.bf16.msra.mxu0 %v1496_v12  ;;  %v478_v12 = vld [vmem:[#allocation8 + $0xc8] sm:$0xff] }
  0x9f   :  { %1501 = vmatprep.subr.bf16.mxu0 %v1500_v15  ;;  %v1540_v14 = vpack.c.bf16 %v480_v13, %v478_v12  ;;  %v663_v12 = vld [vmem:[#allocation10 + $0x228] sm:$0xff] }
  0xa2   :  { %1503 = vmatpush3.bf16.msra.mxu0 %v1500_v15  ;;  %v477_v15 = vld [vmem:[#allocation8 + $0xc0] sm:$0xff] }
  0xa3   :  { %1505 = vmatprep.subr.bf16.mxu0 %v1504_v18  ;;  %v1542_v17 = vpack.c.bf16 %v479_v16, %v477_v15  ;;  %v658_v15 = vld [vmem:[#allocation10 + $0x200] sm:$0xff] }
  0xa4   :  { %v662_v16 = vld [vmem:[#allocation10 + $0x220] sm:$0xff] }
  0xa6   :  { %1507 = vmatpush3.bf16.msra.mxu0 %v1504_v18  ;;  %v482_v18 = vld [vmem:[#allocation8 + $0xe8] sm:$0xff] }
  0xa7   :  { %1509 = vmatprep.subr.bf16.mxu0 %v1508_v21  ;;  %v1544_v20 = vpack.c.bf16 %v484_v19, %v482_v18  ;;  %v671_v18 = vld [vmem:[#allocation10 + $0x268] sm:$0xff]  ;;  %v1582_v19 = vpack.c.bf16 %v662_v16, %v658_v15 }
  0xaa   :  { %1511 = vmatpush3.bf16.msra.mxu0 %v1508_v21  ;;  %v481_v21 = vld [vmem:[#allocation8 + $0xe0] sm:$0xff] }
  0xab   :  { %1513 = vmatprep.subr.bf16.mxu0 %v1512_v24  ;;  %v1546_v23 = vpack.c.bf16 %v483_v22, %v481_v21  ;;  %v666_v21 = vld [vmem:[#allocation10 + $0x240] sm:$0xff] }
  0xac   :  { %v670_v22 = vld [vmem:[#allocation10 + $0x260] sm:$0xff] }
  0xad   :  { %v1586_v26 = vpack.c.bf16 %v670_v22, %v666_v21 }
  0xae   :  { %1515 = vmatpush3.bf16.msra.mxu0 %v1512_v24  ;;  %v1966_v24 = vmov 0.0  }
  0xaf   :  { %1549 = vmatprep.subr.bf16.mxu0 %v1548_v28  ;;  %v674_v28 = vld [vmem:[#allocation10 + $0x280] sm:$0xff] }
 0x164   :  { %v1349_v60 = vpop.f32.mrb[0].mxu0 }
 0x165   :  { %v224_v61 = vadd.f32 %v1349_v60, %v1181_v59  ;;  %v218_v62 = vpop.f32.mrb[1].mxu0 }
 0x166   :  { %v219_v63 = vadd.f32 %v1181_v59, %v218_v62  ;;  %v468_v59 = vld [vmem:[#allocation8 + $0x78] sm:$0xff]  ;;  %v467_v62 = vld [vmem:[#allocation8 + $0x70] sm:$0xff] }
 0x167   :  { %v230_v0 = vmul.f32 0.70710677, %v224_v61  ;;  %v228_v7 = vmul.f32 0.5, %v224_v61  ;;  %v1528_v60 = vpack.c.bf16 %v468_v59, %v466_v58  ;;  %v465_v61 = vld [vmem:[#allocation8 + $0x60] sm:$0xff]  ;;  %v639_v58 = vld [vmem:[#allocation10 + $0x168] sm:$0xff] }
 0x168   :  { %v229_v1 = vmul.f32 0.70710677, %v219_v63  ;;  %v227_v5 = vmul.f32 0.5, %v219_v63  ;;  %v1530_v63 = vpack.c.bf16 %v467_v62, %v465_v61  ;;  %v634_v61 = vld [vmem:[#allocation10 + $0x140] sm:$0xff] }
 0x169   :  { %1754 = verf.f32 %v230_v0  ;;  %v470_v0 = vld [vmem:[#allocation8 + $0x88] sm:$0xff]  ;;  %v638_v62 = vld [vmem:[#allocation10 + $0x160] sm:$0xff] }
 0x16a   :  { %1756 = verf.f32 %v229_v1  ;;  %v472_v1 = vld [vmem:[#allocation8 + $0x98] sm:$0xff] }
 0x173   :  { %v1755_v2 = vpop.eup %1754 }
 0x174   :  { %v1757_v3 = vpop.eup %1756  ;;  %v234_v4 = vadd.f32 1.0, %v1755_v2  ;;  %v1532_v2 = vpack.c.bf16 %v472_v1, %v470_v0  ;;  %v647_v0 = vld [vmem:[#allocation10 + $0x1a8] sm:$0xff]  ;;  %v1570_v1 = vpack.c.bf16 %v638_v62, %v634_v61  ;;  %v625_v61 = vld [vmem:[#allocation10 + $0xf8] sm:$0xff] }
 0x175   :  { %v233_v6 = vadd.f32 1.0, %v1757_v3  ;;  %v469_v3 = vld [vmem:[#allocation8 + $0x80] sm:$0xff] }
 0x176   :  { %v236_v9 = vmul.f32 %v234_v4, %v228_v7  ;;  %v471_v4 = vld [vmem:[#allocation8 + $0x90] sm:$0xff]  ;;  %v476_v7 = vld [vmem:[#allocation8 + $0xb8] sm:$0xff] }
 0x177   :  { %v235_v8 = vmul.f32 %v233_v6, %v227_v5  ;;  %v1534_v5 = vpack.c.bf16 %v471_v4, %v469_v3  ;;  %v474_v6 = vld [vmem:[#allocation8 + $0xa8] sm:$0xff]  ;;  %v642_v3 = vld [vmem:[#allocation10 + $0x180] sm:$0xff] }
 0x178   :  { %v646_v4 = vld [vmem:[#allocation10 + $0x1a0] sm:$0xff] }
 0x179   :  { %1382 = vmatprep.mubr.f32.mxu1 %v235_v8  ;;  %v1536_v8 = vpack.c.bf16 %v476_v7, %v474_v6  ;;  %v655_v6 = vld [vmem:[#allocation10 + $0x1e8] sm:$0xff]  ;;  %v1574_v7 = vpack.c.bf16 %v646_v4, %v642_v3  ;;  %v633_v3 = vld [vmem:[#allocation10 + $0x138] sm:$0xff] }
 0x17a   :  { %1383 = vmatmul.mubr.f32.vlgmr.msra.gmra.mrb[0].mxu1 %v236_v9  ;;  %v473_v9 = vld [vmem:[#allocation8 + $0xa0] sm:$0xff] }
 0x17b   :  { %1519 = vmatpush1.bf16.msra.mxu1 %v1518_v32  ;;  %v1538_v11 = vpack.c.bf16 %v475_v10, %v473_v9  ;;  %561 = vmatprep.mubr.f32.mxu1 %v1966_v24  ;;  %v1612_v32 = vpack.c.bf16 %v601_v29, %v597_v27  ;;  %v650_v9 = vld [vmem:[#allocation10 + $0x1c0] sm:$0xff] }
 0x17c   :  { %1521 = vmatprep.subr.bf16.mxu1 %v1520_v33  ;;  %v1550_v33 = vpack.c.bf16 %v598_v31, %v594_v30  ;;  %v654_v10 = vld [vmem:[#allocation10 + $0x1e0] sm:$0xff] }
 0x17d   :  { %v1578_v13 = vpack.c.bf16 %v654_v10, %v650_v9  ;;  %v678_v29 = vld [vmem:[#allocation10 + $0x2a0] sm:$0xff] }
 0x17e   :  { %v1590_v30 = vpack.c.bf16 %v678_v29, %v674_v28  ;;  %v1183_v31 = vld [vmem:[%s2197_s6] ss:$0 sm:$0xff] }
 0x17f   :  { %1523 = vmatpush1.bf16.msra.mxu1 %v1522_v38  ;;  %v606_v38 = vld [vmem:[#allocation10 + $0x60] sm:$0xff] }
 0x180   :  { %1525 = vmatprep.subr.bf16.mxu1 %v1524_v39  ;;  %v1554_v39 = vpack.c.bf16 %v606_v38, %v602_v37 }
 0x183   :  { %1527 = vmatpush1.bf16.msra.mxu1 %v1526_v42  ;;  %v1556_v42 = vpack.c.bf16 %v615_v41, %v611_v40  ;;  %v600_v40 = vld [vmem:[#allocation10 + $0x30] sm:$0xff] }
 0x184   :  { %1529 = vmatprep.subr.bf16.mxu1 %v1528_v60 }
 0x187   :  { %1531 = vmatpush1.bf16.msra.mxu1 %v1530_v63  ;;  %v643_v63 = vld [vmem:[#allocation10 + $0x188] sm:$0xff] }
 0x188   :  { %1533 = vmatprep.subr.bf16.mxu1 %v1532_v2  ;;  %v1572_v2 = vpack.c.bf16 %v647_v0, %v643_v63  ;;  %v620_v0 = vld [vmem:[#allocation10 + $0xd0] sm:$0xff] }
 0x18b   :  { %1535 = vmatpush1.bf16.msra.mxu1 %v1534_v5  ;;  %v651_v5 = vld [vmem:[#allocation10 + $0x1c8] sm:$0xff] }
 0x18c   :  { %1537 = vmatprep.subr.bf16.mxu1 %v1536_v8  ;;  %v1576_v8 = vpack.c.bf16 %v655_v6, %v651_v5  ;;  %v628_v5 = vld [vmem:[#allocation10 + $0x110] sm:$0xff] }
 0x18d   :  { %v632_v6 = vld [vmem:[#allocation10 + $0x130] sm:$0xff] }
 0x18e   :  { %v1630_v9 = vpack.c.bf16 %v632_v6, %v628_v5  ;;  %v703_v5 = vld [vmem:[#allocation10 + $0x368] sm:$0xff]  ;;  %v701_v6 = vld [vmem:[#allocation10 + $0x358] sm:$0xff] }
 0x18f   :  { %1539 = vmatpush1.bf16.msra.mxu1 %v1538_v11  ;;  %v659_v11 = vld [vmem:[#allocation10 + $0x208] sm:$0xff] }
 0x190   :  { %1541 = vmatprep.subr.bf16.mxu1 %v1540_v14  ;;  %v1580_v14 = vpack.c.bf16 %v663_v12, %v659_v11  ;;  %v636_v11 = vld [vmem:[#allocation10 + $0x150] sm:$0xff] }
 0x191   :  { %v640_v12 = vld [vmem:[#allocation10 + $0x170] sm:$0xff] }
 0x192   :  { %v1634_v15 = vpack.c.bf16 %v640_v12, %v636_v11 }
 0x193   :  { %1543 = vmatpush1.bf16.msra.mxu1 %v1542_v17  ;;  %v667_v17 = vld [vmem:[#allocation10 + $0x248] sm:$0xff] }
 0x194   :  { %1545 = vmatprep.subr.bf16.mxu1 %v1544_v20  ;;  %v1584_v20 = vpack.c.bf16 %v671_v18, %v667_v17  ;;  %v644_v17 = vld [vmem:[#allocation10 + $0x190] sm:$0xff] }
 0x195   :  { %v648_v18 = vld [vmem:[#allocation10 + $0x1b0] sm:$0xff] }
 0x196   :  { %v1638_v21 = vpack.c.bf16 %v648_v18, %v644_v17  ;;  %v711_v17 = vld [vmem:[#allocation10 + $0x3a8] sm:$0xff]  ;;  %v709_v18 = vld [vmem:[#allocation10 + $0x398] sm:$0xff] }
 0x197   :  { %1547 = vmatpush1.bf16.msra.mxu1 %v1546_v23  ;;  %v675_v23 = vld [vmem:[#allocation10 + $0x288] sm:$0xff] }
 0x198   :  { %1613 = vmatprep.subr.bf16.mxu1 %v1612_v32  ;;  %v1588_v27 = vpack.c.bf16 %v679_v25, %v675_v23  ;;  %v652_v23 = vld [vmem:[#allocation10 + $0x1d0] sm:$0xff] }
 0x199   :  { %v656_v25 = vld [vmem:[#allocation10 + $0x1f0] sm:$0xff] }
 0x19a   :  { %v1642_v28 = vpack.c.bf16 %v656_v25, %v652_v23 }
 0x24d   :  { %v1384_v44 = vpop.f32.mrb[0].mxu1 }
 0x24e   :  { %v332_v45 = vadd.f32 %v1384_v44, %v1182_v43  ;;  %v326_v46 = vpop.f32.mrb[1].mxu1  ;;  %v614_v44 = vld [vmem:[#allocation10 + $0xa0] sm:$0xff] }
 0x24f   :  { %v327_v47 = vadd.f32 %v1182_v43, %v326_v46  ;;  %v610_v43 = vld [vmem:[#allocation10 + $0x80] sm:$0xff]  ;;  %v619_v46 = vld [vmem:[#allocation10 + $0xc8] sm:$0xff] }
 0x250   :  { %v338_v48 = vmul.f32 0.70710677, %v332_v45  ;;  %v336_v55 = vmul.f32 0.5, %v332_v45  ;;  %v1558_v45 = vpack.c.bf16 %v614_v44, %v610_v43  ;;  %v609_v43 = vld [vmem:[#allocation10 + $0x78] sm:$0xff] }
 0x251   :  { %v337_v49 = vmul.f32 0.70710677, %v327_v47  ;;  %v335_v53 = vmul.f32 0.5, %v327_v47  ;;  %v623_v47 = vld [vmem:[#allocation10 + $0xe8] sm:$0xff] }
 0x252   :  { %1758 = verf.f32 %v338_v48  ;;  %v1560_v48 = vpack.c.bf16 %v623_v47, %v619_v46 }
 0x253   :  { %1760 = verf.f32 %v337_v49  ;;  %v618_v49 = vld [vmem:[#allocation10 + $0xc0] sm:$0xff] }
 0x25c   :  { %v1759_v50 = vpop.eup %1758 }
 0x25d   :  { %v1761_v51 = vpop.eup %1760  ;;  %v342_v52 = vadd.f32 1.0, %v1759_v50  ;;  %v622_v50 = vld [vmem:[#allocation10 + $0xe0] sm:$0xff] }
 0x25e   :  { %v341_v54 = vadd.f32 1.0, %v1761_v51  ;;  %v627_v51 = vld [vmem:[#allocation10 + $0x108] sm:$0xff] }
 0x25f   :  { %v344_v57 = vmul.f32 %v342_v52, %v336_v55  ;;  %v631_v52 = vld [vmem:[#allocation10 + $0x128] sm:$0xff]  ;;  %v626_v55 = vld [vmem:[#allocation10 + $0x100] sm:$0xff] }
 0x260   :  { %v343_v56 = vmul.f32 %v341_v54, %v335_v53  ;;  %v1562_v53 = vpack.c.bf16 %v622_v50, %v618_v49  ;;  %v1564_v54 = vpack.c.bf16 %v631_v52, %v627_v51  ;;  %v604_v50 = vld [vmem:[#allocation10 + $0x50] sm:$0xff]  ;;  %v613_v52 = vld [vmem:[#allocation10 + $0x98] sm:$0xff] }
 0x261   :  { %v608_v51 = vld [vmem:[#allocation10 + $0x70] sm:$0xff] }
 0x262   :  { %1417 = vmatprep.mubr.f32.mxu0 %v343_v56  ;;  %v630_v56 = vld [vmem:[#allocation10 + $0x120] sm:$0xff] }
 0x263   :  { %1418 = vmatmul.mubr.f32.vlgmr.msra.gmra.mrb[2].mxu0 %v344_v57  ;;  %v635_v57 = vld [vmem:[#allocation10 + $0x148] sm:$0xff]  ;;  %v1566_v59 = vpack.c.bf16 %v630_v56, %v626_v55  ;;  %v1618_v55 = vpack.c.bf16 %v608_v51, %v604_v50  ;;  %v682_v50 = vld [vmem:[#allocation10 + $0x2c0] sm:$0xff] }
 0x264   :  { %1551 = vmatpush1.bf16.msra.mxu0 %v1550_v33  ;;  %v1568_v60 = vpack.c.bf16 %v639_v58, %v635_v57  ;;  %v612_v58 = vld [vmem:[#allocation10 + $0x90] sm:$0xff]  ;;  %v686_v51 = vld [vmem:[#allocation10 + $0x2e0] sm:$0xff] }
 0x265   :  { %1553 = vmatprep.subr.bf16.mxu0 %v1552_v36 }
 0x268   :  { %1555 = vmatpush1.bf16.msra.mxu0 %v1554_v39  ;;  %v596_v39 = vld [vmem:[#allocation10 + $0x10] sm:$0xff] }
 0x269   :  { %1557 = vmatprep.subr.bf16.mxu0 %v1556_v42  ;;  %v605_v42 = vld [vmem:[#allocation10 + $0x58] sm:$0xff]  ;;  %v1614_v46 = vpack.c.bf16 %v600_v40, %v596_v39 }
 0x26a   :  { %v1616_v49 = vpack.c.bf16 %v609_v43, %v605_v42  ;;  %v681_v39 = vld [vmem:[#allocation10 + $0x2b8] sm:$0xff]  ;;  %v676_v42 = vld [vmem:[#allocation10 + $0x290] sm:$0xff] }
 0x26b   :  { %v680_v43 = vld [vmem:[#allocation10 + $0x2b0] sm:$0xff] }
 0x26c   :  { %1559 = vmatpush1.bf16.msra.mxu0 %v1558_v45 }
 0x26d   :  { %1561 = vmatprep.subr.bf16.mxu0 %v1560_v48 }
 0x270   :  { %1563 = vmatpush1.bf16.msra.mxu0 %v1562_v53  ;;  %v617_v53 = vld [vmem:[#allocation10 + $0xb8] sm:$0xff] }
 0x271   :  { %1565 = vmatprep.subr.bf16.mxu0 %v1564_v54  ;;  %v1620_v57 = vpack.c.bf16 %v617_v53, %v613_v52  ;;  %v1594_v53 = vpack.c.bf16 %v686_v51, %v682_v50  ;;  %v485_v50 = vld [vmem:[%s2199_s8] sm:$0x3] }
 0x274   :  { %1567 = vmatpush1.bf16.msra.mxu0 %v1566_v59  ;;  %v616_v59 = vld [vmem:[#allocation10 + $0xb0] sm:$0xff] }
 0x275   :  { %1569 = vmatprep.subr.bf16.mxu0 %v1568_v60  ;;  %v621_v60 = vld [vmem:[#allocation10 + $0xd8] sm:$0xff]  ;;  %v1622_v62 = vpack.c.bf16 %v616_v59, %v612_v58  ;;  %v695_v58 = vld [vmem:[#allocation10 + $0x328] sm:$0xff] }
 0x276   :  { %v1624_v63 = vpack.c.bf16 %v625_v61, %v621_v60  ;;  %v693_v59 = vld [vmem:[#allocation10 + $0x318] sm:$0xff] }
 0x277   :  { %v697_v61 = vld [vmem:[#allocation10 + $0x338] sm:$0xff] }
 0x278   :  { %1571 = vmatpush1.bf16.msra.mxu0 %v1570_v1  ;;  %v624_v1 = vld [vmem:[#allocation10 + $0xf0] sm:$0xff] }
 0x279   :  { %1573 = vmatprep.subr.bf16.mxu0 %v1572_v2  ;;  %v629_v2 = vld [vmem:[#allocation10 + $0x118] sm:$0xff] }
 0x27a   :  { %v1628_v4 = vpack.c.bf16 %v633_v3, %v629_v2  ;;  %v692_v2 = vld [vmem:[#allocation10 + $0x310] sm:$0xff] }
 0x27b   :  { %v696_v3 = vld [vmem:[#allocation10 + $0x330] sm:$0xff] }
 0x27c   :  { %1575 = vmatpush1.bf16.msra.mxu0 %v1574_v7  ;;  %v637_v7 = vld [vmem:[#allocation10 + $0x158] sm:$0xff] }
 0x27d   :  { %1577 = vmatprep.subr.bf16.mxu0 %v1576_v8  ;;  %v641_v8 = vld [vmem:[#allocation10 + $0x178] sm:$0xff] }
 0x27e   :  { %v1632_v10 = vpack.c.bf16 %v641_v8, %v637_v7  ;;  %v705_v8 = vld [vmem:[#allocation10 + $0x378] sm:$0xff] }
 0x27f   :  { %v1664_v11 = vpack.c.bf16 %v705_v8, %v701_v6  ;;  %v970_v6 = vld [vmem:[#allocation11 + $0x100] sm:$0xff]  ;;  %v956_v8 = vld [vmem:[#allocation11 + $0x90] sm:$0xff] }
 0x280   :  { %1579 = vmatpush1.bf16.msra.mxu0 %v1578_v13  ;;  %v645_v13 = vld [vmem:[#allocation10 + $0x198] sm:$0xff] }
 0x281   :  { %1581 = vmatprep.subr.bf16.mxu0 %v1580_v14  ;;  %v649_v14 = vld [vmem:[#allocation10 + $0x1b8] sm:$0xff] }
 0x282   :  { %v1636_v16 = vpack.c.bf16 %v649_v14, %v645_v13  ;;  %v700_v13 = vld [vmem:[#allocation10 + $0x350] sm:$0xff] }
 0x283   :  { %v704_v14 = vld [vmem:[#allocation10 + $0x370] sm:$0xff] }
 0x284   :  { %1583 = vmatpush1.bf16.msra.mxu0 %v1582_v19  ;;  %v653_v19 = vld [vmem:[#allocation10 + $0x1d8] sm:$0xff] }
 0x285   :  { %1585 = vmatprep.subr.bf16.mxu0 %v1584_v20  ;;  %v657_v20 = vld [vmem:[#allocation10 + $0x1f8] sm:$0xff] }
 0x286   :  { %v1640_v22 = vpack.c.bf16 %v657_v20, %v653_v19  ;;  %v713_v20 = vld [vmem:[#allocation10 + $0x3b8] sm:$0xff] }
 0x287   :  { %v1668_v23 = vpack.c.bf16 %v713_v20, %v709_v18  ;;  %v941_v20 = vld [vmem:[#allocation11 + $0x18] sm:$0xff] }
 0x288   :  { %1587 = vmatpush1.bf16.msra.mxu0 %v1586_v26  ;;  %v661_v26 = vld [vmem:[#allocation10 + $0x218] sm:$0xff] }
 0x289   :  { %1589 = vmatprep.subr.bf16.mxu0 %v1588_v27  ;;  %v665_v27 = vld [vmem:[#allocation10 + $0x238] sm:$0xff] }
 0x28a   :  { %v1644_v29 = vpack.c.bf16 %v665_v27, %v661_v26  ;;  %v708_v26 = vld [vmem:[#allocation10 + $0x390] sm:$0xff] }
 0x28b   :  { %v712_v27 = vld [vmem:[#allocation10 + $0x3b0] sm:$0xff] }
 0x28c   :  { %1591 = vmatpush1.bf16.msra.mxu0 %v1590_v30  ;;  %v660_v30 = vld [vmem:[#allocation10 + $0x210] sm:$0xff] }
 0x336   :  { %v1419_v32 = vpop.f32.mrb[2].mxu0 }
 0x337   :  { %v440_v33 = vadd.f32 %v1419_v32, %v1183_v31  ;;  %v434_v34 = vpop.f32.mrb[3].mxu0  ;;  %v669_v32 = vld [vmem:[#allocation10 + $0x258] sm:$0xff] }
 0x338   :  { %v435_v35 = vadd.f32 %v1183_v31, %v434_v34  ;;  %v664_v31 = vld [vmem:[#allocation10 + $0x230] sm:$0xff] }
 0x339   :  { %v446_v36 = vmul.f32 0.70710677, %v440_v33  ;;  %v444_v54 = vmul.f32 0.5, %v440_v33  ;;  %v673_v33 = vld [vmem:[#allocation10 + $0x278] sm:$0xff]  ;;  %v1646_v34 = vpack.c.bf16 %v664_v31, %v660_v30  ;;  %v719_v30 = vld [vmem:[#allocation10 + $0x3e8] sm:$0xff] }
 0x33a   :  { %v445_v37 = vmul.f32 0.70710677, %v435_v35  ;;  %v443_v44 = vmul.f32 0.5, %v435_v35  ;;  %v1648_v35 = vpack.c.bf16 %v673_v33, %v669_v32  ;;  %v717_v31 = vld [vmem:[#allocation10 + $0x3d8] sm:$0xff] }
 0x33b   :  { %1762 = verf.f32 %v446_v36  ;;  %v668_v36 = vld [vmem:[#allocation10 + $0x250] sm:$0xff]  ;;  %v721_v33 = vld [vmem:[#allocation10 + $0x3f8] sm:$0xff] }
 0x33c   :  { %1764 = verf.f32 %v445_v37  ;;  %v672_v37 = vld [vmem:[#allocation10 + $0x270] sm:$0xff] }
 0x33d   :  { %v1650_v40 = vpack.c.bf16 %v672_v37, %v668_v36  ;;  %v1672_v36 = vpack.c.bf16 %v721_v33, %v717_v31  ;;  %v990_v33 = vld [vmem:[#allocation11 + $0x1a0] sm:$0xff] }
 0x345   :  { %v1763_v38 = vpop.eup %1762 }
 0x346   :  { %v1765_v41 = vpop.eup %1764  ;;  %v450_v47 = vadd.f32 1.0, %v1763_v38  ;;  %v677_v38 = vld [vmem:[#allocation10 + $0x298] sm:$0xff] }
 0x347   :  { %v449_v45 = vadd.f32 1.0, %v1765_v41  ;;  %v1652_v41 = vpack.c.bf16 %v681_v39, %v677_v38  ;;  %v716_v38 = vld [vmem:[#allocation10 + $0x3d0] sm:$0xff] }
 0x348   :  { %v452_v56 = vmul.f32 %v450_v47, %v444_v54  ;;  %v685_v47 = vld [vmem:[#allocation10 + $0x2d8] sm:$0xff]  ;;  %v684_v54 = vld [vmem:[#allocation10 + $0x2d0] sm:$0xff] }
 0x349   :  { %v451_v48 = vmul.f32 %v449_v45, %v443_v44  ;;  %v1654_v44 = vpack.c.bf16 %v680_v43, %v676_v42  ;;  %v683_v45 = vld [vmem:[#allocation10 + $0x2c8] sm:$0xff]  ;;  %v720_v39 = vld [vmem:[#allocation10 + $0x3f0] sm:$0xff]  ;;  %v986_v43 = vld [vmem:[#allocation11 + $0x180] sm:$0xff] }
 0x34a   :  { %v955_v42 = vld [vmem:[#allocation11 + $0x88] sm:$0xff] }
 0x34b   :  { %562 = vmatmul.mubr.f32.vlgmr.msra.gmra.mrb[2].mxu1 %v451_v48 }
 0x34c   :  { %567 = vmatprep.mubr.f32.mxu1 %v1966_v24  ;;  %1615 = vmatpush1.bf16.msra.mxu1 %v1614_v46  ;;  %v1626_v24 = vpack.c.bf16 %v624_v1, %v620_v0  ;;  %v687_v46 = vld [vmem:[#allocation10 + $0x2e8] sm:$0xff]  ;;  %v1660_v0 = vpack.c.bf16 %v697_v61, %v693_v59 }
 0x34d   :  { %1617 = vmatprep.subr.bf16.mxu1 %v1616_v49  ;;  %v1592_v48 = vpack.c.bf16 %v687_v46, %v683_v45  ;;  %v689_v49 = vld [vmem:[#allocation10 + $0x2f8] sm:$0xff]  ;;  %v987_v45 = vld [vmem:[#allocation11 + $0x188] sm:$0xff] }
 0x34e   :  { %v1656_v52 = vpack.c.bf16 %v689_v49, %v685_v47  ;;  %v1708_v46 = vpack.c.bf16 %v987_v45, %v986_v43  ;;  %v487_v47 = vlaneseq  ;;  %v943_v43 = vld [vmem:[#allocation11 + $0x28] sm:$0xff] }
 0x34f   :  { %568 = vmatmul.mubr.f32.gmra.mrb[4].mxu1 %v452_v56  ;;  %1593 = vmatprep.subr.bf16.mxu0 %v1592_v48  ;;  %v975_v45 = vld [vmem:[#allocation11 + $0x128] sm:$0xff] }
 0x350   :  { %1619 = vmatpush1.bf16.msra.mxu1 %v1618_v55  ;;  %v688_v55 = vld [vmem:[#allocation10 + $0x2f0] sm:$0xff]  ;;  %1595 = vmatpush1.bf16.msra.mxu0 %v1594_v53  ;;  %v2153_v48 = vshrl.u32 %v487_v47, 7 }
 0x351   :  { %1621 = vmatprep.subr.bf16.mxu1 %v1620_v57  ;;  %v1658_v56 = vpack.c.bf16 %v688_v55, %v684_v54  ;;  %v691_v57 = vld [vmem:[#allocation10 + $0x308] sm:$0xff] }
 0x352   :  { %v1596_v60 = vpack.c.bf16 %v695_v58, %v691_v57  ;;  %v489_v49 = vsub.s32 0, %v2153_v48  ;;  %v493_v51 = vsub.s32 1, %v2153_v48 }
 0x354   :  { %1623 = vmatpush1.bf16.msra.mxu1 %v1622_v62  ;;  %v690_v62 = vld [vmem:[#allocation10 + $0x300] sm:$0xff]  ;;  %1597 = vmatprep.subr.bf16.mxu0 %v1596_v60  ;;  %v494_v53 = vrot.slane %v485_v50, %v493_v51 }
 0x355   :  { %1625 = vmatprep.subr.bf16.mxu1 %v1624_v63  ;;  %v694_v63 = vld [vmem:[#allocation10 + $0x320] sm:$0xff] }
 0x356   :  { %v1598_v1 = vpack.c.bf16 %v694_v63, %v690_v62 }
 0x358   :  { %1627 = vmatpush1.bf16.msra.mxu1 %v1626_v24  ;;  %v1662_v24 = vpack.c.bf16 %v696_v3, %v692_v2  ;;  %1599 = vmatpush1.bf16.msra.mxu0 %v1598_v1  ;;  %v938_v3 = vld [vmem:[#allocation11] sm:$0xff] }
 0x359   :  { %1629 = vmatprep.subr.bf16.mxu1 %v1628_v4  ;;  %v699_v4 = vld [vmem:[#allocation10 + $0x348] sm:$0xff] }
 0x35a   :  { %v1600_v7 = vpack.c.bf16 %v703_v5, %v699_v4 }
 0x35c   :  { %1631 = vmatpush1.bf16.msra.mxu1 %v1630_v9  ;;  %v698_v9 = vld [vmem:[#allocation10 + $0x340] sm:$0xff]  ;;  %1601 = vmatprep.subr.bf16.mxu0 %v1600_v7  ;;  %v971_v7 = vld [vmem:[#allocation11 + $0x108] sm:$0xff] }
 0x35d   :  { %1633 = vmatprep.subr.bf16.mxu1 %v1632_v10  ;;  %v702_v10 = vld [vmem:[#allocation10 + $0x360] sm:$0xff]  ;;  %v1710_v18 = vpack.c.bf16 %v971_v7, %v970_v6 }
 0x35e   :  { %v1602_v12 = vpack.c.bf16 %v702_v10, %v698_v9  ;;  %v978_v7 = vld [vmem:[#allocation11 + $0x140] sm:$0xff] }
 0x360   :  { %1635 = vmatpush1.bf16.msra.mxu1 %v1634_v15  ;;  %v1666_v15 = vpack.c.bf16 %v704_v14, %v700_v13  ;;  %1603 = vmatpush1.bf16.msra.mxu0 %v1602_v12  ;;  %v988_v12 = vld [vmem:[#allocation11 + $0x190] sm:$0xff]  ;;  %v989_v13 = vld [vmem:[#allocation11 + $0x198] sm:$0xff] }
 0x361   :  { %1637 = vmatprep.subr.bf16.mxu1 %v1636_v16  ;;  %v707_v16 = vld [vmem:[#allocation10 + $0x388] sm:$0xff] }
 0x362   :  { %v1604_v19 = vpack.c.bf16 %v711_v17, %v707_v16 }
 0x364   :  { %1639 = vmatpush1.bf16.msra.mxu1 %v1638_v21  ;;  %v706_v21 = vld [vmem:[#allocation10 + $0x380] sm:$0xff]  ;;  %1605 = vmatprep.subr.bf16.mxu0 %v1604_v19  ;;  %v940_v19 = vld [vmem:[#allocation11 + $0x10] sm:$0xff] }
 0x365   :  { %1641 = vmatprep.subr.bf16.mxu1 %v1640_v22  ;;  %v710_v22 = vld [vmem:[#allocation10 + $0x3a0] sm:$0xff] }
 0x366   :  { %v1606_v25 = vpack.c.bf16 %v710_v22, %v706_v21 }
 0x368   :  { %1643 = vmatpush1.bf16.msra.mxu1 %v1642_v28  ;;  %v1670_v28 = vpack.c.bf16 %v712_v27, %v708_v26  ;;  %1607 = vmatpush1.bf16.msra.mxu0 %v1606_v25  ;;  %v1712_v26 = vpack.c.bf16 %v989_v13, %v988_v12  ;;  %v972_v27 = vld [vmem:[#allocation11 + $0x110] sm:$0xff] }
 0x369   :  { %1645 = vmatprep.subr.bf16.mxu1 %v1644_v29  ;;  %v715_v29 = vld [vmem:[#allocation10 + $0x3c8] sm:$0xff]  ;;  %v996_v12 = vld [vmem:[#allocation11 + $0x1d0] sm:$0xff] }
 0x36a   :  { %v1608_v32 = vpack.c.bf16 %v719_v30, %v715_v29  ;;  %v958_v29 = vld [vmem:[#allocation11 + $0xa0] sm:$0xff] }
 0x36c   :  { %1647 = vmatpush1.bf16.msra.mxu1 %v1646_v34  ;;  %v714_v34 = vld [vmem:[#allocation10 + $0x3c0] sm:$0xff]  ;;  %1609 = vmatprep.subr.bf16.mxu0 %v1608_v32  ;;  %v959_v32 = vld [vmem:[#allocation11 + $0xa8] sm:$0xff] }
 0x36d   :  { %1649 = vmatprep.subr.bf16.mxu1 %v1648_v35  ;;  %v718_v35 = vld [vmem:[#allocation10 + $0x3e0] sm:$0xff] }
 0x36e   :  { %v1610_v37 = vpack.c.bf16 %v718_v35, %v714_v34  ;;  %v991_v34 = vld [vmem:[#allocation11 + $0x1a8] sm:$0xff] }
 0x370   :  { %1651 = vmatpush1.bf16.msra.mxu1 %v1650_v40  ;;  %v1674_v40 = vpack.c.bf16 %v720_v39, %v716_v38  ;;  %1611 = vmatpush1.bf16.msra.mxu0 %v1610_v37  ;;  %v1682_v37 = vpack.c.bf16 %v941_v20, %v940_v19  ;;  %v942_v39 = vld [vmem:[#allocation11 + $0x20] sm:$0xff]  ;;  %v980_v19 = vld [vmem:[#allocation11 + $0x150] sm:$0xff]  ;;  %v981_v20 = vld [vmem:[#allocation11 + $0x158] sm:$0xff] }
 0x371   :  { %1653 = vmatprep.subr.bf16.mxu1 %v1652_v41  ;;  %v954_v41 = vld [vmem:[#allocation11 + $0x80] sm:$0xff] }
 0x374   :  { %1655 = vmatpush1.bf16.msra.mxu1 %v1654_v44  ;;  %v1676_v44 = vpack.c.bf16 %v955_v42, %v954_v41  ;;  %v1684_v41 = vpack.c.bf16 %v959_v32, %v958_v29  ;;  %v1716_v42 = vpack.c.bf16 %v991_v34, %v990_v33  ;;  %v951_v29 = vld [vmem:[#allocation11 + $0x68] sm:$0xff]  ;;  %v982_v32 = vld [vmem:[#allocation11 + $0x160] sm:$0xff] }
 0x375   :  { %1657 = vmatprep.subr.bf16.mxu1 %v1656_v52  ;;  %v490_v52 = vrot.slane %v485_v50, %v489_v49  ;;  %v960_v50 = vld [vmem:[#allocation11 + $0xb0] sm:$0xff]  ;;  %v983_v33 = vld [vmem:[#allocation11 + $0x168] sm:$0xff] }
 0x376   :  { %1677 = vmatprep.subr.bf16.mxu0 %v1676_v44  ;;  %v974_v44 = vld [vmem:[#allocation11 + $0x120] sm:$0xff]  ;;  %v1734_v34 = vpack.c.bf16 %v983_v33, %v982_v32 }
 0x377   :  { %v1718_v47 = vpack.c.bf16 %v975_v45, %v974_v44  ;;  %v984_v44 = vld [vmem:[#allocation11 + $0x170] sm:$0xff]  ;;  %v985_v45 = vld [vmem:[#allocation11 + $0x178] sm:$0xff] }
 0x378   :  { %1659 = vmatpush1.bf16.msra.mxu1 %v1658_v56 }
 0x379   :  { %1661 = vmatprep.subr.bf16.mxu1 %v1660_v0 }
 0x37c   :  { %1663 = vmatpush1.bf16.msra.mxu1 %v1662_v24  ;;  %v939_v24 = vld [vmem:[#allocation11 + $0x8] sm:$0xff] }
 0x37d   :  { %1665 = vmatprep.subr.bf16.mxu1 %v1664_v11  ;;  %v957_v11 = vld [vmem:[#allocation11 + $0x98] sm:$0xff]  ;;  %v1678_v17 = vpack.c.bf16 %v939_v24, %v938_v3  ;;  %v995_v3 = vld [vmem:[#allocation11 + $0x1c8] sm:$0xff]  ;;  %v946_v24 = vld [vmem:[#allocation11 + $0x40] sm:$0xff] }
 0x37e   :  { %v1680_v25 = vpack.c.bf16 %v957_v11, %v956_v8  ;;  %v979_v8 = vld [vmem:[#allocation11 + $0x148] sm:$0xff]  ;;  %v965_v11 = vld [vmem:[#allocation11 + $0xd8] sm:$0xff] }
 0x380   :  { %1667 = vmatpush1.bf16.msra.mxu1 %v1666_v15 }
 0x381   :  { %1669 = vmatprep.subr.bf16.mxu1 %v1668_v23 }
 0x384   :  { %1671 = vmatpush1.bf16.msra.mxu1 %v1670_v28  ;;  %v973_v28 = vld [vmem:[#allocation11 + $0x118] sm:$0xff] }
 0x385   :  { %1673 = vmatprep.subr.bf16.mxu1 %v1672_v36  ;;  %v1714_v38 = vpack.c.bf16 %v973_v28, %v972_v27  ;;  %v999_v27 = vld [vmem:[#allocation11 + $0x1e8] sm:$0xff]  ;;  %v950_v28 = vld [vmem:[#allocation11 + $0x60] sm:$0xff] }
 0x388   :  { %1675 = vmatpush1.bf16.msra.mxu1 %v1674_v40 }
 0x389   :  { %1709 = vmatprep.subr.bf16.mxu1 %v1708_v46  ;;  %v1686_v46 = vpack.c.bf16 %v943_v43, %v942_v39  ;;  %v1001_v39 = vld [vmem:[#allocation11 + $0x1f8] sm:$0xff] }
 0x41e   :  { %v563_v54 = vpop.f32.mrb[2].mxu1 }
 0x41f   :  { %v564_v55 = vadd.f32 %v563_v54, %v490_v52  ;;  %v565_v56 = vpop.f32.mrb[3].mxu1 }
 0x420   :  { %v566_v57 = vadd.f32 %v565_v56, %v494_v53  ;;  %v944_v56 = vld [vmem:[#allocation11 + $0x30] sm:$0xff] }
 0x421   :  { %v578_v58 = vmul.f32 0.70710677, %v564_v55  ;;  %v574_v14 = vmul.f32 0.5, %v564_v55  ;;  %v993_v55 = vld [vmem:[#allocation11 + $0x1b8] sm:$0xff] }
 0x422   :  { %v579_v59 = vmul.f32 0.70710677, %v566_v57  ;;  %v569_v60 = vpop.f32.mrb[4].mxu1  ;;  %v575_v9 = vmul.f32 0.5, %v566_v57  ;;  %v945_v57 = vld [vmem:[#allocation11 + $0x38] sm:$0xff] }
 0x423   :  { %1766 = verf.f32 %v578_v58  ;;  %v570_v61 = vadd.f32 %v569_v60, %v490_v52  ;;  %v571_v62 = vpop.f32.mrb[5].mxu1  ;;  %v961_v52 = vld [vmem:[#allocation11 + $0xb8] sm:$0xff]  ;;  %v976_v60 = vld [vmem:[#allocation11 + $0x130] sm:$0xff] }
 0x424   :  { %1768 = verf.f32 %v579_v59  ;;  %v572_v63 = vadd.f32 %v571_v62, %v494_v53  ;;  %v992_v53 = vld [vmem:[#allocation11 + $0x1b0] sm:$0xff]  ;;  %v1688_v54 = vpack.c.bf16 %v961_v52, %v960_v50  ;;  %v1690_v59 = vpack.c.bf16 %v945_v57, %v944_v56  ;;  %v722_v50 = vld [vmem:[%s2201_s10] sm:$0xf] }
 0x425   :  { %v580_v0 = vmul.f32 0.70710677, %v570_v61  ;;  %v576_v35 = vmul.f32 0.5, %v570_v61  ;;  %v1720_v58 = vpack.c.bf16 %v993_v55, %v992_v53  ;;  %v977_v61 = vld [vmem:[#allocation11 + $0x138] sm:$0xff]  ;;  %v738_v52 = vsub.s32 3, %v2153_v48 }
 0x426   :  { %v581_v1 = vmul.f32 0.70710677, %v572_v63  ;;  %v577_v30 = vmul.f32 0.5, %v572_v63  ;;  %v1722_v62 = vpack.c.bf16 %v977_v61, %v976_v60  ;;  %v962_v63 = vld [vmem:[#allocation11 + $0xc0] sm:$0xff]  ;;  %v727_v53 = vrot.slane %v722_v50, %v489_v49 }
 0x427   :  { %1770 = verf.f32 %v580_v0  ;;  %v963_v0 = vld [vmem:[#allocation11 + $0xc8] sm:$0xff]  ;;  %v731_v55 = vrot.slane %v722_v50, %v493_v51  ;;  %v739_v56 = vrot.slane %v722_v50, %v738_v52 }
 0x428   :  { %1772 = verf.f32 %v581_v1  ;;  %v994_v1 = vld [vmem:[#allocation11 + $0x1c0] sm:$0xff] }
 0x42d   :  { %v1767_v2 = vpop.eup %1766 }
 0x42e   :  { %v1769_v4 = vpop.eup %1768  ;;  %v586_v5 = vadd.f32 1.0, %v1767_v2  ;;  %v1692_v2 = vpack.c.bf16 %v963_v0, %v962_v63 }
 0x42f   :  { %v587_v10 = vadd.f32 1.0, %v1769_v4  ;;  %v947_v4 = vld [vmem:[#allocation11 + $0x48] sm:$0xff] }
 0x430   :  { %v590_v22 = vmul.f32 %v586_v5, %v574_v14  ;;  %v1724_v5 = vpack.c.bf16 %v995_v3, %v994_v1  ;;  %v1694_v6 = vpack.c.bf16 %v947_v4, %v946_v24  ;;  %v997_v14 = vld [vmem:[#allocation11 + $0x1d8] sm:$0xff] }
 0x431   :  { %v1771_v15 = vpop.eup %1770  ;;  %v591_v16 = vmul.f32 %v587_v10, %v575_v9  ;;  %v1726_v9 = vpack.c.bf16 %v979_v8, %v978_v7  ;;  %v964_v10 = vld [vmem:[#allocation11 + $0xd0] sm:$0xff] }
 0x432   :  { %v1773_v21 = vpop.eup %1772  ;;  %v588_v23 = vadd.f32 1.0, %v1771_v15  ;;  %v1696_v13 = vpack.c.bf16 %v965_v11, %v964_v10  ;;  %v948_v15 = vld [vmem:[#allocation11 + $0x50] sm:$0xff] }
 0x433   :  { %v589_v31 = vadd.f32 1.0, %v1773_v21  ;;  %808 = vmatprep.mubr.f32.mxu0 %v591_v16  ;;  %885 = vmatprep.mubr.f32.mxu1 %v591_v16  ;;  %v949_v16 = vld [vmem:[#allocation11 + $0x58] sm:$0xff]  ;;  %v1730_v21 = vpack.c.bf16 %v981_v20, %v980_v19 }
 0x434   :  { %809 = vmatmul.mubr.f32.vlgmr.msra.gmra.mrb[4].mxu0 %v590_v22  ;;  %886 = vmatmul.mubr.f32.vlgmr.msra.gmra.mrb[6].mxu1 %v590_v22  ;;  %v592_v40 = vmul.f32 %v588_v23, %v576_v35  ;;  %v966_v22 = vld [vmem:[#allocation11 + $0xe0] sm:$0xff]  ;;  %v967_v23 = vld [vmem:[#allocation11 + $0xe8] sm:$0xff]  ;;  %v968_v35 = vld [vmem:[#allocation11 + $0xf0] sm:$0xff] }
 0x435   :  { %v593_v36 = vmul.f32 %v589_v31, %v577_v30  ;;  %1679 = vmatpush3.bf16.msra.mxu0 %v1678_v17  ;;  %1711 = vmatpush3.bf16.msra.mxu1 %v1710_v18  ;;  %v1728_v17 = vpack.c.bf16 %v997_v14, %v996_v12  ;;  %v1698_v18 = vpack.c.bf16 %v949_v16, %v948_v15 }
 0x436   :  { %1681 = vmatprep.subr.bf16.mxu0 %v1680_v25  ;;  %1713 = vmatprep.subr.bf16.mxu1 %v1712_v26  ;;  %v998_v25 = vld [vmem:[#allocation11 + $0x1e0] sm:$0xff]  ;;  %v1700_v26 = vpack.c.bf16 %v967_v23, %v966_v22  ;;  %v1702_v31 = vpack.c.bf16 %v951_v29, %v950_v28 }
 0x437   :  { %814 = vmatprep.mubr.f32.mxu0 %v593_v36  ;;  %891 = vmatprep.mubr.f32.mxu1 %v593_v36  ;;  %v1732_v30 = vpack.c.bf16 %v999_v27, %v998_v25  ;;  %v969_v36 = vld [vmem:[#allocation11 + $0xf8] sm:$0xff] }
 0x438   :  { %815 = vmatmul.mubr.f32.gmra.mrb[6].mxu0 %v592_v40  ;;  %892 = vmatmul.mubr.f32.gmra.mrb[8].mxu1 %v592_v40  ;;  %v952_v40 = vld [vmem:[#allocation11 + $0x70] sm:$0xff] }
 0x439   :  { %1683 = vmatpush3.bf16.msra.mxu0 %v1682_v37  ;;  %1715 = vmatpush3.bf16.msra.mxu1 %v1714_v38  ;;  %v1000_v37 = vld [vmem:[#allocation11 + $0x1f0] sm:$0xff]  ;;  %v1704_v38 = vpack.c.bf16 %v969_v36, %v968_v35 }
 0x43a   :  { %1685 = vmatprep.subr.bf16.mxu0 %v1684_v41  ;;  %1717 = vmatprep.subr.bf16.mxu1 %v1716_v42  ;;  %v953_v41 = vld [vmem:[#allocation11 + $0x78] sm:$0xff]  ;;  %v1736_v42 = vpack.c.bf16 %v1001_v39, %v1000_v37 }
 0x43b   :  { %v1706_v43 = vpack.c.bf16 %v953_v41, %v952_v40 }
 0x43d   :  { %1687 = vmatpush3.bf16.msra.mxu0 %v1686_v46  ;;  %1719 = vmatpush3.bf16.msra.mxu1 %v1718_v47  ;;  %v1738_v46 = vpack.c.bf16 %v985_v45, %v984_v44  ;;  %v734_v47 = vsub.s32 2, %v2153_v48 }
 0x43e   :  { %1689 = vmatprep.subr.bf16.mxu0 %v1688_v54  ;;  %1721 = vmatprep.subr.bf16.mxu1 %v1720_v58 }
 0x43f   :  { %v735_v54 = vrot.slane %v722_v50, %v734_v47  ;;  %v1184_v50 = vld [vmem:[%s2203_s12] ss:$0 sm:$0xff]  ;;  %s1922_s12 = scalar_lea.vmem %s1167_s29, 256 }
 0x440   :  { %p1923_p6 = scmp.ne.s32.totalorder %s1167_s29, %s1922_s12  ;;  %p1928_p8 = scmp.lt.s32.totalorder %s1922_s12, %s1922_s12 }
 0x441   :  { %1691 = vmatpush3.bf16.msra.mxu0 %v1690_v59  ;;  %1723 = vmatpush3.bf16.msra.mxu1 %v1722_v62 }
 0x442   :  { %1693 = vmatprep.subr.bf16.mxu0 %v1692_v2  ;;  %1725 = vmatprep.subr.bf16.mxu1 %v1724_v5  ;;  %p1929_p9 = por %p1928_p8, %p1927_p7 }
 0x444   :  { %p1930_p10 = pnand %p1929_p9, %p1923_p6 }
 0x445   :  { %1695 = vmatpush3.bf16.msra.mxu0 %v1694_v6  ;;  %1727 = vmatpush3.bf16.msra.mxu1 %v1726_v9 }
 0x446   :  { %1697 = vmatprep.subr.bf16.mxu0 %v1696_v13  ;;  %1729 = vmatprep.subr.bf16.mxu1 %v1728_v17 }
 0x449   :  { %1699 = vmatpush3.bf16.msra.mxu0 %v1698_v18  ;;  %1731 = vmatpush3.bf16.msra.mxu1 %v1730_v21 }
 0x44a   :  { %1701 = vmatprep.subr.bf16.mxu0 %v1700_v26  ;;  %1733 = vmatprep.subr.bf16.mxu1 %v1732_v30 }
 0x44d   :  { %1703 = vmatpush3.bf16.msra.mxu0 %v1702_v31  ;;  %1735 = vmatpush3.bf16.msra.mxu1 %v1734_v34 }
 0x44e   :  { %1705 = vmatprep.subr.bf16.mxu0 %v1704_v38  ;;  %1737 = vmatprep.subr.bf16.mxu1 %v1736_v42 }
 0x451   :  { %1707 = vmatpush3.bf16.msra.mxu0 %v1706_v43  ;;  %1739 = vmatpush3.bf16.msra.mxu1 %v1738_v46 }
 0x507   :  { %v810_v57 = vpop.f32.mrb[4].mxu0  ;;  %v887_v58 = vpop.f32.mrb[6].mxu1 }
 0x508   :  { %v811_v59 = vadd.f32 %v810_v57, %v727_v53  ;;  %v888_v60 = vadd.f32 %v887_v58, %v735_v54  ;;  %v812_v61 = vpop.f32.mrb[5].mxu0  ;;  %v889_v62 = vpop.f32.mrb[7].mxu1 }
 0x509   :  { %v813_v63 = vadd.f32 %v812_v61, %v731_v55  ;;  %v890_v0 = vadd.f32 %v889_v62, %v739_v56 }
 0x50a   :  { %v906_v1 = vmul.f32 0.70710677, %v811_v59  ;;  %v908_v2 = vmul.f32 0.70710677, %v888_v60  ;;  %v898_v21 = vmul.f32 0.5, %v811_v59  ;;  %v900_v26 = vmul.f32 0.5, %v888_v60 }
 0x50b   :  { %v907_v3 = vmul.f32 0.70710677, %v813_v63  ;;  %v909_v24 = vmul.f32 0.70710677, %v890_v0  ;;  %v816_v4 = vpop.f32.mrb[6].mxu0  ;;  %v893_v49 = vpop.f32.mrb[8].mxu1 }
 0x50c   :  { %1774 = verf.f32 %v906_v1  ;;  %v817_v5 = vadd.f32 %v816_v4, %v727_v53  ;;  %v894_v48 = vadd.f32 %v893_v49, %v735_v54  ;;  %v818_v51 = vpop.f32.mrb[7].mxu0  ;;  %v895_v6 = vpop.f32.mrb[9].mxu1  ;;  %v899_v19 = vmul.f32 0.5, %v813_v63 }
 0x50d   :  { %1776 = verf.f32 %v908_v2  ;;  %v819_v7 = vadd.f32 %v818_v51, %v731_v55  ;;  %v896_v8 = vadd.f32 %v895_v6, %v739_v56  ;;  %v901_v22 = vmul.f32 0.5, %v890_v0 }
 0x50e   :  { %1778 = verf.f32 %v907_v3  ;;  %v910_v9 = vmul.f32 0.70710677, %v817_v5  ;;  %v912_v10 = vmul.f32 0.70710677, %v894_v48  ;;  %v902_v38 = vmul.f32 0.5, %v817_v5 }
 0x50f   :  { %1780 = verf.f32 %v909_v24  ;;  %v911_v11 = vmul.f32 0.70710677, %v819_v7  ;;  %v913_v12 = vmul.f32 0.70710677, %v896_v8  ;;  %v903_v36 = vmul.f32 0.5, %v819_v7 }
 0x510   :  { %1782 = verf.f32 %v910_v9  ;;  %v905_v39 = vmul.f32 0.5, %v896_v8  ;;  %v904_v41 = vmul.f32 0.5, %v894_v48 }
 0x511   :  { %1784 = verf.f32 %v912_v10 }
 0x512   :  { %1786 = verf.f32 %v911_v11 }
 0x513   :  { %1788 = verf.f32 %v913_v12 }
 0x516   :  { %v1775_v13 = vpop.eup %1774 }
 0x517   :  { %v1777_v14 = vpop.eup %1776  ;;  %v922_v16 = vadd.f32 1.0, %v1775_v13 }
 0x518   :  { %v1779_v15 = vpop.eup %1778  ;;  %v924_v18 = vadd.f32 1.0, %v1777_v14 }
 0x519   :  { %v1781_v17 = vpop.eup %1780  ;;  %v923_v20 = vadd.f32 1.0, %v1779_v15  ;;  %v930_v29 = vmul.f32 %v922_v16, %v898_v21 }
 0x51a   :  { %v925_v23 = vadd.f32 1.0, %v1781_v17  ;;  %v1783_v25 = vpop.eup %1782  ;;  %v932_v32 = vmul.f32 %v924_v18, %v900_v26 }
 0x51b   :  { %v931_v27 = vmul.f32 %v923_v20, %v899_v19  ;;  %v1785_v28 = vpop.eup %1784  ;;  %v926_v33 = vadd.f32 1.0, %v1783_v25 }
 0x51c   :  { %v933_v30 = vmul.f32 %v925_v23, %v901_v22  ;;  %v1787_v31 = vpop.eup %1786  ;;  %v928_v35 = vadd.f32 1.0, %v1785_v28 }
 0x51d   :  { %1073 = vmatprep.mubr.f32.mxu0 %v931_v27  ;;  %v1789_v34 = vpop.eup %1788  ;;  %v927_v37 = vadd.f32 1.0, %v1787_v31  ;;  %v934_v44 = vmul.f32 %v926_v33, %v902_v38 }
 0x51e   :  { %1148 = vmatprep.mubr.f32.mxu1 %v933_v30  ;;  %1074 = vmatmul.mubr.f32.vlgmr.msra.gmra.mrb[8].mxu0 %v930_v29  ;;  %v929_v40 = vadd.f32 1.0, %v1789_v34  ;;  %v936_v45 = vmul.f32 %v928_v35, %v904_v41 }
 0x51f   :  { %1149 = vmatmul.mubr.f32.vlgmr.msra.gmra.mrb[10].mxu1 %v932_v32  ;;  %v935_v42 = vmul.f32 %v927_v37, %v903_v36 }
 0x520   :  { %v937_v43 = vmul.f32 %v929_v40, %v905_v39 }
 0x521   :  { %1078 = vmatprep.mubr.f32.mxu0 %v935_v42 }
 0x522   :  { %1153 = vmatprep.mubr.f32.mxu1 %v937_v43  ;;  %1079 = vmatmul.mubr.f32.gmra.mrb[10].mxu0 %v934_v44 }
 0x523   :  { %1154 = vmatmul.mubr.f32.gmra.mrb[12].mxu1 %v936_v45 }
 0x5f1   :  { %v1271_v46 = vpop.f32.mrb[8].mxu0 }
 0x5f2   :  { %v1309_v47 = vpop.f32.mrb[10].mxu1  ;;  %v1272_v52 = vpop.f32.mrb[9].mxu0 }
 0x5f3   :  { %v1273_v53 = vadd.f32 %v1272_v52, %v1271_v46  ;;  %v1310_v54 = vpop.f32.mrb[11].mxu1 }
 0x5f4   :  { %v1311_v55 = vadd.f32 %v1310_v54, %v1309_v47 }
 0x5f5   :  { %v1076_v56 = vadd.f32 %v1273_v53, %v1184_v50  ;;  %v1274_v57 = vpop.f32.mrb[10].mxu0 }
 0x5f6   :  { %v1312_v59 = vpop.f32.mrb[12].mxu1  ;;  %v1275_v60 = vpop.f32.mrb[11].mxu0 }
 0x5f7   :  { %v1151_v58 = vadd.f32 %v1311_v55, %v1076_v56  ;;  %v1276_v61 = vadd.f32 %v1275_v60, %v1274_v57  ;;  %v1313_v62 = vpop.f32.mrb[13].mxu1 }
 0x5f8   :  { %v1314_v63 = vadd.f32 %v1313_v62, %v1312_v59 }
 0x5f9   :  { %1159 = vst [vmem:[#allocation13] sm:$0xff] %v1151_v58  ;;  %v1081_v0 = vadd.f32 %v1276_v61, %v1184_v50 }
 0x5fb   :  { %v1156_v1 = vadd.f32 %v1314_v63, %v1081_v0 }
 0x5fd   :  { %1160 = vst [vmem:[#allocation13 + $0x8] sm:$0xff] %v1156_v1 }
 0x5fe   :  { %1933 = shalt.err (!%p1930_p10)
}
 0x5ff   :  { %s1934_s30 = scalar_lea.hbm %s2204_s13, 256 }
 0x600   :  { %p1935_p11 = scmp.ne.s32.totalorder %s2204_s13, %s1934_s30  ;;  %p1938_p12 = scmp.lt.u32.totalorder %s1934_s30, %s2204_s13 }
 0x602   :  { %p1940_p13 = pnand %p1938_p12, %p1935_p11 }
 0x604   :  { %1943 = shalt.err (!%p1940_p13)
}
 0x605   :  { %1172 = dma.vmem_to_hbm [thread:$0]  %s1167_s29, 256, %s2204_s13, [#allocation4], %s1956_s20, %s1956_s20, %s1957_s21  }
 0x606   :  { %1952 = dma.done.wait [#allocation4], 256  }
 0x607   :  { %1953 = vsyncadd [#allocation4], 4294967040 }
 0x608   :  { %1176 = vsyncpa [#allocation3], 1 }
 0x609   :  { %1177 = vsyncpa [#allocation6], 1 }
 0x60a   :  { %1178 = vsyncpa [#allocation9], 1 }
 0x60b   :  { %1179 = vsyncpa [#allocation12], 1 }
 0x60c   :  { %1180 = vsyncpa [#allocation4], 1 }

</bundles_post_ra>
